<compile_context>
chip_gen: v7x
topology: tpu7x:2x2x1
jax: 0.10.0
libtpu: 0.0.40
codegen_flags: <defaults>
</compile_context>

<pallas_src>
import jax
import jax.numpy as jnp
from jax.experimental import pallas as pl
from jax.experimental.pallas import tpu as pltpu

# ----------------------------- model config ---------------------------------
OBS = 8
ENC_HIDDEN = (128, 128, 64)        # encoder_hidden_size_list
H1, H2, H = ENC_HIDDEN
HEAD_HIDDEN = H                    # head_hidden_size
NUM_BRANCHES = 5
BINS = 2                           # action_bins_per_branch
A_LAYERS = 3                       # a_layer_num (= layer_num)
V_LAYERS = 3                       # v_layer_num (= layer_num)
BATCH = 4

T = H * (NUM_BRANCHES + 1)         # fused tower width: 384
NOUT = NUM_BRANCHES * BINS         # flattened logits:  10
LANE_E = max(H1, H2)               # lane width of the "encoder + final" blob: 128

_r8 = lambda n: -(-n // 8) * 8     # round up to a multiple of 8 (sublane tile)

# ---- packed-parameter blob layouts (all row offsets 8-aligned) ---------------
# Blob A ("enc"): lane width 128 — encoder weights/biases + fused final layer.
EW0_R = 0
EW1_R = EW0_R + _r8(OBS)           # 8
EW2_R = EW1_R + H1                 # 136
WF_R = EW2_R + H2                  # 264   (fused final weight, lanes 0:NOUT)
EB0_R = WF_R + T                   # 648
EB1_R = EB0_R + 8                  # 656
EB2_R = EB1_R + 8                  # 664
BF_R = EB2_R + 8                   # 672
ENC_ROWS = BF_R + 8                # 680

# Blob B ("tow"): lane width 384 — fused tower hidden layers.
W1_R = 0                           # (H, T)   shared-input layer
W2_R = W1_R + H                    # (T, T)   block-diagonal
W3_R = W2_R + T                    # (T, T)   block-diagonal
B1_R = W3_R + T                    # 832
B2_R = B1_R + 8                    # 840
B3_R = B2_R + 8                    # 848
TOW_ROWS = B3_R + 8                # 856


# ------------------------------- kernel -------------------------------------
def bdq_kernel(x_ref, enc_ref, tow_ref, out_ref):
    f32 = jnp.float32
    relu = lambda t: jnp.maximum(t, 0.0)
    dot = lambda a, b: jnp.dot(a, b, preferred_element_type=f32)

    x = x_ref[...].astype(f32)

    # ---- FCEncoder: 3 x (Linear + ReLU); 1/(num_branches+1) folded into layer 3 ----
    h = relu(dot(x, enc_ref[EW0_R:EW0_R + OBS, :]) + enc_ref[EB0_R:EB0_R + 1, :])
    h = relu(dot(h, enc_ref[EW1_R:EW1_R + H1, :]) + enc_ref[EB1_R:EB1_R + 1, :])
    h = relu(dot(h, enc_ref[EW2_R:EW2_R + H2, 0:H]) + enc_ref[EB2_R:EB2_R + 1, 0:H])

    # ---- fused value + 5 advantage towers (block-diagonal hidden layers) ----
    z = relu(dot(h, tow_ref[W1_R:W1_R + H, :]) + tow_ref[B1_R:B1_R + 1, :])
    z = relu(dot(z, tow_ref[W2_R:W2_R + T, :]) + tow_ref[B2_R:B2_R + 1, :])
    z = relu(dot(z, tow_ref[W3_R:W3_R + T, :]) + tow_ref[B3_R:B3_R + 1, :])

    # ---- fused final layer: value broadcast + per-branch dueling mean-subtraction
    #      are already folded into the packed weights -> single matmul, single store.
    out_ref[...] = (dot(z, enc_ref[WF_R:WF_R + T, 0:NOUT])
                    + enc_ref[BF_R:BF_R + 1, 0:NOUT])


# ------------------------------ wrapper --------------------------------------
def bdq_forward(x, packed):
    """x: (B, OBS) f32;  packed: (enc_blob, tower_blob) from pack_params()."""
    enc_blob, tow_blob = packed
    B = x.shape[0]
    BP = _r8(B)                                # fill the (8,128) f32 sublane tile
    if BP != B:
        x = jnp.pad(x, ((0, BP - B), (0, 0)))
    # NOTE: for large batches, add a batch grid with
    # dimension_semantics=("parallel",) to use both v7x TensorCores; at this
    # size a single grid-less program is the right choice.
    out_flat = pl.pallas_call(
        bdq_kernel,
        out_shape=jax.ShapeDtypeStruct((BP, NOUT), jnp.float32),
        in_specs=[pl.BlockSpec(memory_space=pltpu.MemorySpace.VMEM)] * 3,
        out_specs=pl.BlockSpec(memory_space=pltpu.MemorySpace.VMEM),
    )(x, enc_blob, tow_blob)
    return {'logit': out_flat[:B].reshape(B, NUM_BRANCHES, BINS)}


# --------------------------- parameter init ----------------------------------
def _linear_init(key, fan_in, fan_out):
    """torch.nn.Linear-style U(-1/sqrt(fan_in), 1/sqrt(fan_in)) init."""
    kw, kb = jax.random.split(key)
    bound = 1.0 / float(fan_in) ** 0.5
    w = jax.random.uniform(kw, (fan_in, fan_out), jnp.float32, -bound, bound)
    b = jax.random.uniform(kb, (1, fan_out), jnp.float32, -bound, bound)
    return w, b


def make_params(key):
    """Unfused, torch-layout parameters (weights stored as (in, out))."""
    keys = iter(jax.random.split(key, 64))
    ew0, eb0 = _linear_init(next(keys), OBS, H1)
    ew1, eb1 = _linear_init(next(keys), H1, H2)
    ew2, eb2 = _linear_init(next(keys), H2, H)
    vws, vbs = [], []
    for _ in range(V_LAYERS):
        w, b = _linear_init(next(keys), HEAD_HIDDEN, HEAD_HIDDEN)
        vws.append(w); vbs.append(b[0])
    vw = jnp.stack(vws)                           # (V_LAYERS, H, H)
    vb = jnp.stack(vbs)                           # (V_LAYERS, H)
    vfw, vfb = _linear_init(next(keys), HEAD_HIDDEN, 1)   # (H,1), (1,1)
    aws, abs_, afws, afbs = [], [], [], []
    for _ in range(NUM_BRANCHES):
        ws, bs = [], []
        for _ in range(A_LAYERS):
            w, b = _linear_init(next(keys), HEAD_HIDDEN, HEAD_HIDDEN)
            ws.append(w); bs.append(b[0])
        aws.append(jnp.stack(ws)); abs_.append(jnp.stack(bs))
        fw, fb = _linear_init(next(keys), HEAD_HIDDEN, BINS)
        afws.append(fw); afbs.append(fb[0])
    aw = jnp.stack(aws)                           # (NB, A_LAYERS, H, H)
    ab = jnp.stack(abs_)                          # (NB, A_LAYERS, H)
    afw = jnp.stack(afws)                         # (NB, H, BINS)
    afb = jnp.stack(afbs)                         # (NB, BINS)
    return (ew0, eb0, ew1, eb1, ew2, eb2, vw, vb, vfw, vfb, aw, ab, afw, afb)


# ------------------------ host-side parameter packing ------------------------
def pack_params(params):
    """Fuse towers + fold scale / dueling mean / value broadcast, pack into 2 blobs.

    Done once; the blobs can be cached across calls so the kernel sees exactly
    3 inputs (x + 2 parameter blobs) every invocation.
    """
    (ew0, eb0, ew1, eb1, ew2, eb2, vw, vb, vfw, vfb, aw, ab, afw, afb) = params
    NB = NUM_BRANCHES
    scale = 1.0 / (NB + 1)

    # fused tower layer 0 (all towers share input h) and block-diagonal layers 1-2
    W1 = jnp.concatenate([vw[0]] + [aw[b, 0] for b in range(NB)], axis=1)   # (H, T)
    b1 = jnp.concatenate([vb[0]] + [ab[b, 0] for b in range(NB)], axis=0)   # (T,)

    def block_diag(layer):
        out = jnp.zeros((T, T), jnp.float32)
        blocks = [vw[layer]] + [aw[b, layer] for b in range(NB)]
        for i, blk in enumerate(blocks):
            out = out.at[i * H:(i + 1) * H, i * H:(i + 1) * H].set(blk)
        return out

    W2, W3 = block_diag(1), block_diag(2)
    b2 = jnp.concatenate([vb[1]] + [ab[b, 1] for b in range(NB)], axis=0)
    b3 = jnp.concatenate([vb[2]] + [ab[b, 2] for b in range(NB)], axis=0)

    # fused final layer: per-branch dueling centering (I - 1/BINS) folded into the
    # advantage weights/biases; value column replicated to every output lane.
    M = jnp.eye(BINS, dtype=jnp.float32) - 1.0 / BINS                       # (BINS, BINS)
    Wf = jnp.zeros((T, NOUT), jnp.float32)
    Wf = Wf.at[0:H, :].set(jnp.tile(vfw, (1, NOUT)))                        # value -> all lanes
    bf = jnp.full((NOUT,), vfb[0, 0], jnp.float32)
    for b in range(NB):
        Wf = Wf.at[H * (b + 1):H * (b + 2), b * BINS:(b + 1) * BINS].set(afw[b] @ M)
        bf = bf.at[b * BINS:(b + 1) * BINS].add(afb[b] @ M)

    # ---- blob A: encoder (scale folded into layer 3) + fused final layer ----
    enc = jnp.zeros((ENC_ROWS, LANE_E), jnp.float32)
    enc = enc.at[EW0_R:EW0_R + OBS, :].set(ew0)
    enc = enc.at[EW1_R:EW1_R + H1, :].set(ew1)
    enc = enc.at[EW2_R:EW2_R + H2, 0:H].set(ew2 * scale)
    enc = enc.at[WF_R:WF_R + T, 0:NOUT].set(Wf)
    enc = enc.at[EB0_R, :].set(eb0[0])
    enc = enc.at[EB1_R, :].set(eb1[0])
    enc = enc.at[EB2_R, 0:H].set(eb2[0] * scale)
    enc = enc.at[BF_R, 0:NOUT].set(bf)

    # ---- blob B: fused tower hidden layers ----
    tow = jnp.zeros((TOW_ROWS, T), jnp.float32)
    tow = tow.at[W1_R:W1_R + H, :].set(W1)
    tow = tow.at[W2_R:W2_R + T, :].set(W2)
    tow = tow.at[W3_R:W3_R + T, :].set(W3)
    tow = tow.at[B1_R, :].set(b1)
    tow = tow.at[B2_R, :].set(b2)
    tow = tow.at[B3_R, :].set(b3)
    return enc, tow


# ------------------------- pure-JAX reference --------------------------------
def bdq_ref(x, params):
    (ew0, eb0, ew1, eb1, ew2, eb2, vw, vb, vfw, vfb, aw, ab, afw, afb) = params
    hi = jax.lax.Precision.HIGHEST
    relu = lambda t: jnp.maximum(t, 0.0)
    h = relu(jnp.dot(x, ew0, precision=hi) + eb0)
    h = relu(jnp.dot(h, ew1, precision=hi) + eb1)
    h = relu(jnp.dot(h, ew2, precision=hi) + eb2)
    h = h / float(NUM_BRANCHES + 1)
    v = h
    for l in range(V_LAYERS):
        v = relu(jnp.dot(v, vw[l], precision=hi) + vb[l][None, :])
    value = jnp.dot(v, vfw, precision=hi) + vfb           # (B,1)
    outs = []
    for b in range(NUM_BRANCHES):
        a = h
        for l in range(A_LAYERS):
            a = relu(jnp.dot(a, aw[b, l], precision=hi) + ab[b, l][None, :])
        s = jnp.dot(a, afw[b], precision=hi) + afb[b][None, :]
        outs.append(s)
    scores = jnp.stack(outs, axis=1)                      # (B, NB, BINS)
    scores = scores - jnp.mean(scores, axis=2, keepdims=True)
    return value[:, :, None] + scores                     # (B, NB, BINS)


# --------------------------------- main ---------------------------------------
if __name__ == "__main__":
    key = jax.random.PRNGKey(0)
    kx, kp = jax.random.split(key)
    x = jax.random.normal(kx, (BATCH, OBS), jnp.float32)
    params = make_params(kp)
    packed = pack_params(params)      # done once; reuse across forward calls

    out = bdq_forward(x, packed)
    logit = jax.block_until_ready(out['logit'])

    assert logit.shape == (BATCH, NUM_BRANCHES, BINS), logit.shape
    ref = bdq_ref(x, params)
    assert jnp.allclose(logit, ref, rtol=5e-3, atol=5e-3), \
        float(jnp.max(jnp.abs(logit - ref)))

    print("KERNEL_OK")
</pallas_src>

<mosaic_0001>
module attributes {stable_mosaic.version = 11 : i64} {
  func.func @bdq_kernel(%arg0: memref<8x8xf32, #tpu.memory_space<vmem>>, %arg1: memref<680x128xf32, #tpu.memory_space<vmem>>, %arg2: memref<856x384xf32, #tpu.memory_space<vmem>>, %arg3: memref<8x10xf32, #tpu.memory_space<vmem>>) attributes {dimension_semantics = [], scalar_prefetch = 0 : i64, scratch_operands = 0 : i64, tpu.core_type = #tpu.core_type<tc>} {
    %c0 = arith.constant 0 : index
    %c0_0 = arith.constant 0 : index
    %0 = vector.load %arg0[%c0, %c0_0] : memref<8x8xf32, #tpu.memory_space<vmem>>, vector<8x8xf32>
    %c0_1 = arith.constant 0 : index
    %c0_2 = arith.constant 0 : index
    %1 = vector.load %arg1[%c0_1, %c0_2] : memref<680x128xf32, #tpu.memory_space<vmem>>, vector<8x128xf32>
    %cst = arith.constant dense<0.000000e+00> : vector<8x128xf32>
    %2 = tpu.matmul %0, %1, %cst {dimension_numbers = #tpu.dot_dimension_numbers<[1], [0], [0], [1], [0, 0, 1, 1], [], []>} : vector<8x8xf32>, vector<8x128xf32>, vector<8x128xf32> -> vector<8x128xf32>
    %c648 = arith.constant 648 : index
    %c0_3 = arith.constant 0 : index
    %3 = vector.load %arg1[%c648, %c0_3] : memref<680x128xf32, #tpu.memory_space<vmem>>, vector<1x128xf32>
    %4 = vector.broadcast %3 : vector<1x128xf32> to vector<8x128xf32>
    %5 = arith.addf %2, %4 : vector<8x128xf32>
    %cst_4 = arith.constant 0.000000e+00 : f32
    %6 = vector.broadcast %cst_4 : f32 to vector<8x128xf32>
    %7 = arith.maximumf %5, %6 : vector<8x128xf32>
    %c8 = arith.constant 8 : index
    %c0_5 = arith.constant 0 : index
    %8 = vector.load %arg1[%c8, %c0_5] : memref<680x128xf32, #tpu.memory_space<vmem>>, vector<128x128xf32>
    %cst_6 = arith.constant dense<0.000000e+00> : vector<8x128xf32>
    %9 = tpu.matmul %7, %8, %cst_6 {dimension_numbers = #tpu.dot_dimension_numbers<[1], [0], [0], [1], [0, 0, 1, 1], [], []>} : vector<8x128xf32>, vector<128x128xf32>, vector<8x128xf32> -> vector<8x128xf32>
    %c656 = arith.constant 656 : index
    %c0_7 = arith.constant 0 : index
    %10 = vector.load %arg1[%c656, %c0_7] : memref<680x128xf32, #tpu.memory_space<vmem>>, vector<1x128xf32>
    %11 = vector.broadcast %10 : vector<1x128xf32> to vector<8x128xf32>
    %12 = arith.addf %9, %11 : vector<8x128xf32>
    %cst_8 = arith.constant 0.000000e+00 : f32
    %13 = vector.broadcast %cst_8 : f32 to vector<8x128xf32>
    %14 = arith.maximumf %12, %13 : vector<8x128xf32>
    %c136 = arith.constant 136 : index
    %c0_9 = arith.constant 0 : index
    %15 = vector.load %arg1[%c136, %c0_9] : memref<680x128xf32, #tpu.memory_space<vmem>>, vector<128x64xf32>
    %cst_10 = arith.constant dense<0.000000e+00> : vector<8x64xf32>
    %16 = tpu.matmul %14, %15, %cst_10 {dimension_numbers = #tpu.dot_dimension_numbers<[1], [0], [0], [1], [0, 0, 1, 1], [], []>} : vector<8x128xf32>, vector<128x64xf32>, vector<8x64xf32> -> vector<8x64xf32>
    %c664 = arith.constant 664 : index
    %c0_11 = arith.constant 0 : index
    %17 = vector.load %arg1[%c664, %c0_11] : memref<680x128xf32, #tpu.memory_space<vmem>>, vector<1x64xf32>
    %18 = vector.broadcast %17 : vector<1x64xf32> to vector<8x64xf32>
    %19 = arith.addf %16, %18 : vector<8x64xf32>
    %cst_12 = arith.constant 0.000000e+00 : f32
    %20 = vector.broadcast %cst_12 : f32 to vector<8x64xf32>
    %21 = arith.maximumf %19, %20 : vector<8x64xf32>
    %c0_13 = arith.constant 0 : index
    %c0_14 = arith.constant 0 : index
    %22 = vector.load %arg2[%c0_13, %c0_14] : memref<856x384xf32, #tpu.memory_space<vmem>>, vector<64x384xf32>
    %cst_15 = arith.constant dense<0.000000e+00> : vector<8x384xf32>
    %23 = tpu.matmul %21, %22, %cst_15 {dimension_numbers = #tpu.dot_dimension_numbers<[1], [0], [0], [1], [0, 0, 1, 1], [], []>} : vector<8x64xf32>, vector<64x384xf32>, vector<8x384xf32> -> vector<8x384xf32>
    %c832 = arith.constant 832 : index
    %c0_16 = arith.constant 0 : index
    %24 = vector.load %arg2[%c832, %c0_16] : memref<856x384xf32, #tpu.memory_space<vmem>>, vector<1x384xf32>
    %25 = vector.broadcast %24 : vector<1x384xf32> to vector<8x384xf32>
    %26 = arith.addf %23, %25 : vector<8x384xf32>
    %cst_17 = arith.constant 0.000000e+00 : f32
    %27 = vector.broadcast %cst_17 : f32 to vector<8x384xf32>
    %28 = arith.maximumf %26, %27 : vector<8x384xf32>
    %c64 = arith.constant 64 : index
    %c0_18 = arith.constant 0 : index
    %29 = vector.load %arg2[%c64, %c0_18] : memref<856x384xf32, #tpu.memory_space<vmem>>, vector<384x384xf32>
    %cst_19 = arith.constant dense<0.000000e+00> : vector<8x384xf32>
    %30 = tpu.matmul %28, %29, %cst_19 {dimension_numbers = #tpu.dot_dimension_numbers<[1], [0], [0], [1], [0, 0, 1, 1], [], []>} : vector<8x384xf32>, vector<384x384xf32>, vector<8x384xf32> -> vector<8x384xf32>
    %c840 = arith.constant 840 : index
    %c0_20 = arith.constant 0 : index
    %31 = vector.load %arg2[%c840, %c0_20] : memref<856x384xf32, #tpu.memory_space<vmem>>, vector<1x384xf32>
    %32 = vector.broadcast %31 : vector<1x384xf32> to vector<8x384xf32>
    %33 = arith.addf %30, %32 : vector<8x384xf32>
    %cst_21 = arith.constant 0.000000e+00 : f32
    %34 = vector.broadcast %cst_21 : f32 to vector<8x384xf32>
    %35 = arith.maximumf %33, %34 : vector<8x384xf32>
    %c448 = arith.constant 448 : index
    %c0_22 = arith.constant 0 : index
    %36 = vector.load %arg2[%c448, %c0_22] : memref<856x384xf32, #tpu.memory_space<vmem>>, vector<384x384xf32>
    %cst_23 = arith.constant dense<0.000000e+00> : vector<8x384xf32>
    %37 = tpu.matmul %35, %36, %cst_23 {dimension_numbers = #tpu.dot_dimension_numbers<[1], [0], [0], [1], [0, 0, 1, 1], [], []>} : vector<8x384xf32>, vector<384x384xf32>, vector<8x384xf32> -> vector<8x384xf32>
    %c848 = arith.constant 848 : index
    %c0_24 = arith.constant 0 : index
    %38 = vector.load %arg2[%c848, %c0_24] : memref<856x384xf32, #tpu.memory_space<vmem>>, vector<1x384xf32>
    %39 = vector.broadcast %38 : vector<1x384xf32> to vector<8x384xf32>
    %40 = arith.addf %37, %39 : vector<8x384xf32>
    %cst_25 = arith.constant 0.000000e+00 : f32
    %41 = vector.broadcast %cst_25 : f32 to vector<8x384xf32>
    %42 = arith.maximumf %40, %41 : vector<8x384xf32>
    %c264 = arith.constant 264 : index
    %c0_26 = arith.constant 0 : index
    %43 = vector.load %arg1[%c264, %c0_26] : memref<680x128xf32, #tpu.memory_space<vmem>>, vector<384x10xf32>
    %cst_27 = arith.constant dense<0.000000e+00> : vector<8x10xf32>
    %44 = tpu.matmul %42, %43, %cst_27 {dimension_numbers = #tpu.dot_dimension_numbers<[1], [0], [0], [1], [0, 0, 1, 1], [], []>} : vector<8x384xf32>, vector<384x10xf32>, vector<8x10xf32> -> vector<8x10xf32>
    %c672 = arith.constant 672 : index
    %c0_28 = arith.constant 0 : index
    %45 = vector.load %arg1[%c672, %c0_28] : memref<680x128xf32, #tpu.memory_space<vmem>>, vector<1x10xf32>
    %46 = vector.broadcast %45 : vector<1x10xf32> to vector<8x10xf32>
    %47 = arith.addf %44, %46 : vector<8x10xf32>
    %c0_29 = arith.constant 0 : index
    %c0_30 = arith.constant 0 : index
    %48 = vector.load %arg3[%c0_29, %c0_30] : memref<8x10xf32, #tpu.memory_space<vmem>>, vector<8x10xf32>
    tpu.vector_store %arg3[%c0_29, %c0_30], %47 {strides = array<i32>} : memref<8x10xf32, #tpu.memory_space<vmem>>, vector<8x10xf32>,
    return
  }
}

</mosaic_0001>

<bundles_post_ra>
// kernel: tpu_custom_call.1
= control target key start
LH: loop header
LB: loop body
LE: loop exit
PB: predicated region body
PF: predicated region fallthrough
CT: control target
= control target key end

     0   :  { %8 = vsyncpa [#allocation3], 0  ;;  %s2743_s0 = inlined_call_operand.hbm [shape: f32[8,8], index: 0, kind: input, shape index: {}]   ;;  %s2744_s1 = inlined_call_operand.hbm [shape: f32[680,128], index: 1, kind: input, shape index: {}]   ;;  %s2745_s2 = inlined_call_operand.hbm [shape: f32[856,384], index: 2, kind: input, shape index: {}]   ;;  %s2746_s3 = inlined_call_operand.hbm [shape: f32[8,10], index: 3, kind: output, shape index: {}]  }
   0x1   :  { %9 = vsyncpa [#allocation6], 0 }
   0x2   :  { %10 = vsyncpa [#allocation4], 0  ;;  %s2571_s12 = smov [#allocation5]   ;;  %s2477_s16 = scalar_lea.hbm %s2744_s1, 10880 }
   0x3   :  { %s26_s13 = sshll.u32 %s2571_s12, 4  ;;  %p2478_p0 = scmp.ne.s32.totalorder %s2744_s1, %s2477_s16  ;;  %s27_s13 = int_to_ptr.vmem [resolvable:$true] %s26_s13 }
   0x4   :  { %p2481_p1 = scmp.lt.u32.totalorder %s2477_s16, %s2744_s1 }
   0x6   :  { %p2483_p2 = pnand %p2481_p1, %p2478_p0 }
   0x8   :  { %2486 = shalt.err (!%p2483_p2)
}
   0x9   :  { %s2487_s21 = scalar_lea.vmem %s27_s13, 10880  ;;  %p2492_p4 = scmp.lt.s32.totalorder %s27_s13, %s27_s13 }
   0xa   :  { %p2488_p3 = scmp.ne.s32.totalorder %s27_s13, %s2487_s21  ;;  %p2493_p5 = scmp.lt.s32.totalorder %s2487_s21, %s2487_s21 }
   0xc   :  { %p2494_p6 = por %p2493_p5, %p2492_p4 }
   0xe   :  { %p2495_p7 = pnand %p2494_p6, %p2488_p3 }
  0x10   :  { %2498 = shalt.err (!%p2495_p7)
}
  0x11   :  { %s2572_s22 = smov 128   ;;  %s2573_s23 = smov 8  }
  0x12   :  { %32 = dma.hbm_to_vmem [thread:$0]  %s2744_s1, 10880, %s27_s13, [#allocation6], %s2572_s22, %s2572_s22, %s2573_s23  }
  0x13   :  { %s2574_s26 = smov [#allocation2]   ;;  %s2575_s28 = smov [#allocation7]  }
  0x14   :  { %s17_s27 = sshll.u32 %s2574_s26, 4  ;;  %s38_s29 = sshll.u32 %s2575_s28, 4  ;;  %s18_s27 = int_to_ptr.vmem [resolvable:$true] %s17_s27  ;;  %s39_s29 = int_to_ptr.vmem [resolvable:$true] %s38_s29 }
  0x15   :  { %s2499_s5 = scalar_lea.hbm %s2743_s0, 128 }
  0x16   :  { %p2500_p8 = scmp.ne.s32.totalorder %s2743_s0, %s2499_s5  ;;  %p2503_p9 = scmp.lt.u32.totalorder %s2499_s5, %s2743_s0 }
  0x18   :  { %p2505_p10 = pnand %p2503_p9, %p2500_p8 }
  0x1a   :  { %2508 = shalt.err (!%p2505_p10)
}
  0x1b   :  { %s2509_s1 = scalar_lea.vmem %s18_s27, 128  ;;  %p2514_p12 = scmp.lt.s32.totalorder %s18_s27, %s18_s27 }
  0x1c   :  { %p2510_p11 = scmp.ne.s32.totalorder %s18_s27, %s2509_s1  ;;  %p2515_p13 = scmp.lt.s32.totalorder %s2509_s1, %s2509_s1 }
  0x1e   :  { %p2516_p0 = por %p2515_p13, %p2514_p12 }
  0x20   :  { %p2517_p1 = pnand %p2516_p0, %p2510_p11 }
  0x22   :  { %2520 = shalt.err (!%p2517_p1)
}
  0x23   :  { %20 = dma.hbm_to_vmem [thread:$0]  %s2743_s0, 128, %s18_s27, [#allocation3]  }
  0x24   :  { %s2521_s14 = scalar_lea.hbm %s2745_s2, 41088 }
  0x25   :  { %p2522_p2 = scmp.ne.s32.totalorder %s2745_s2, %s2521_s14  ;;  %p2525_p3 = scmp.lt.u32.totalorder %s2521_s14, %s2745_s2 }
  0x27   :  { %p2527_p4 = pnand %p2525_p3, %p2522_p2 }
  0x29   :  { %2530 = shalt.err (!%p2527_p4)
}
  0x2a   :  { %s2531_s19 = scalar_lea.vmem %s39_s29, 41088  ;;  %p2536_p6 = scmp.lt.s32.totalorder %s39_s29, %s39_s29 }
  0x2b   :  { %p2532_p5 = scmp.ne.s32.totalorder %s39_s29, %s2531_s19  ;;  %p2537_p7 = scmp.lt.s32.totalorder %s2531_s19, %s2531_s19 }
  0x2d   :  { %p2538_p8 = por %p2537_p7, %p2536_p6 }
  0x2f   :  { %p2539_p9 = pnand %p2538_p8, %p2532_p5 }
  0x31   :  { %2542 = shalt.err (!%p2539_p9)
}
  0x32   :  { %s2576_s0 = smov 384   ;;  %s2577_s20 = smov 24  }
  0x33   :  { %44 = dma.hbm_to_vmem [thread:$0]  %s2745_s2, 41088, %s39_s29, [#allocation6], %s2576_s0, %s2576_s0, %s2577_s20  }
  0x34   :  { %2565 = dma.done.wait [#allocation3], 128  }
  0x35   :  { %2566 = vsyncadd [#allocation3], 4294967168 }
  0x36   :  { %2567 = dma.done.wait [#allocation6], 51968  }
  0x37   :  { %2568 = vsyncadd [#allocation6], 4294915328  ;;  %v2578_v0 = vmov 0.0   ;;  %vm2579_vm0 = vmmov 0   ;;  %v2580_v1 = vmov 0.0|0.0   ;;  %vm61_vm1 = vcmask 64512  }
  0x38   :  { %1823 = vmatprep.subr.mxu0 %v2578_v0  ;;  %1825 = vmatprep.mubr.msk.f32.mxu0 %vm2579_vm0, %v2578_v0  ;;  %v55_v2 = vld [vmem:[#allocation5] sm:$0xff]  ;;  %v54_v3 = vld [vmem:[#allocation2] sm:$0xff]  ;;  %v136_v4 = vld [vmem:[#allocation5 + $0x8] sm:$0xff]  ;;  %vm362_vm2 = vcmask 523264   ;;  %s2581_s2 = smov [#allocation8]   ;;  %vm1597_vm3 = vcmask 80896  }
  0x39   :  { %2022 = vmatprep.subr.bf16.mxu1 %v2580_v1  ;;  %1860 = vmatprep.mubr.msk.f32.mxu1 %vm2579_vm0, %v2578_v0  ;;  %v137_v5 = vld [vmem:[#allocation5 + $0x10] sm:$0xff]  ;;  %v138_v6 = vld [vmem:[#allocation5 + $0x18] sm:$0xff]  ;;  %v139_v7 = vld [vmem:[#allocation5 + $0x20] sm:$0xff]  ;;  %s1605_s23 = sshll.u32 %s2581_s2, 4  ;;  %s1606_s23 = int_to_ptr.vmem [resolvable:$true] %s1605_s23 }
  0x3a   :  { %1824 = vmatpush3.msra.mxu0 %v55_v2  ;;  %v2023_v8 = vpack.c.bf16 %v137_v5, %v136_v4  ;;  %v2026_v9 = vpack.c.bf16 %v139_v7, %v138_v6  ;;  %v140_v10 = vld [vmem:[#allocation5 + $0x28] sm:$0xff]  ;;  %v141_v11 = vld [vmem:[#allocation5 + $0x30] sm:$0xff]  ;;  %v142_v13 = vld [vmem:[#allocation5 + $0x38] sm:$0xff]  ;;  %s2543_s24 = scalar_lea.vmem %s1606_s23, 128  ;;  %p2548_p11 = scmp.lt.s32.totalorder %s1606_s23, %s1606_s23 }
  0x3b   :  { %1826 = vmatmul.mubr.msk.f32.vlgmr.msra.gmra.mrb[0].mxu0 %vm61_vm1, %v54_v3  ;;  %2046 = vmatprep.subr.bf16.mxu0 %v2580_v1  ;;  %v2029_v12 = vpack.c.bf16 %v141_v11, %v140_v10  ;;  %v143_v14 = vld [vmem:[#allocation5 + $0x40] sm:$0xff]  ;;  %v144_v16 = vld [vmem:[#allocation5 + $0x48] sm:$0xff]  ;;  %v145_v17 = vld [vmem:[#allocation5 + $0x50] sm:$0xff]  ;;  %p2544_p10 = scmp.ne.s32.totalorder %s1606_s23, %s2543_s24  ;;  %p2549_p12 = scmp.lt.s32.totalorder %s2543_s24, %s2543_s24 }
  0x3c   :  { %1895 = vmatprep.mubr.msk.f32.mxu0 %vm2579_vm0, %v2578_v0  ;;  %2024 = vmatpush3.bf16.msra.mxu1 %v2023_v8  ;;  %v2032_v15 = vpack.c.bf16 %v143_v14, %v142_v13  ;;  %v2035_v18 = vpack.c.bf16 %v145_v17, %v144_v16  ;;  %v146_v19 = vld [vmem:[#allocation5 + $0x58] sm:$0xff]  ;;  %v147_v20 = vld [vmem:[#allocation5 + $0x60] sm:$0xff]  ;;  %v148_v22 = vld [vmem:[#allocation5 + $0x68] sm:$0xff] }
  0x3d   :  { %2025 = vmatprep.subr.bf16.mxu1 %v2580_v1  ;;  %v2038_v21 = vpack.c.bf16 %v147_v20, %v146_v19  ;;  %v149_v23 = vld [vmem:[#allocation5 + $0x70] sm:$0xff]  ;;  %v150_v25 = vld [vmem:[#allocation5 + $0x78] sm:$0xff]  ;;  %v151_v26 = vld [vmem:[#allocation5 + $0x80] sm:$0xff]  ;;  %p2550_p13 = por %p2549_p12, %p2548_p11 }
  0x3e   :  { %v2041_v24 = vpack.c.bf16 %v149_v23, %v148_v22  ;;  %v2044_v27 = vpack.c.bf16 %v151_v26, %v150_v25  ;;  %v228_v28 = vld [vmem:[#allocation5 + $0x88] sm:$0xff]  ;;  %v229_v29 = vld [vmem:[#allocation5 + $0x90] sm:$0xff]  ;;  %v230_v30 = vld [vmem:[#allocation5 + $0x98] sm:$0xff] }
  0x3f   :  { %v2047_v31 = vpack.c.bf16 %v229_v29, %v228_v28  ;;  %v231_v32 = vld [vmem:[#allocation5 + $0xa0] sm:$0xff]  ;;  %v232_v34 = vld [vmem:[#allocation5 + $0xa8] sm:$0xff]  ;;  %v233_v35 = vld [vmem:[#allocation5 + $0xb0] sm:$0xff]  ;;  %p2551_p0 = pnand %p2550_p13, %p2544_p10 }
  0x40   :  { %2027 = vmatpush3.bf16.msra.mxu1 %v2026_v9  ;;  %v2050_v33 = vpack.c.bf16 %v231_v32, %v230_v30  ;;  %v2053_v36 = vpack.c.bf16 %v233_v35, %v232_v34  ;;  %v234_v37 = vld [vmem:[#allocation5 + $0xb8] sm:$0xff]  ;;  %v235_v38 = vld [vmem:[#allocation5 + $0xc0] sm:$0xff]  ;;  %v236_v40 = vld [vmem:[#allocation5 + $0xc8] sm:$0xff] }
  0x41   :  { %2028 = vmatprep.subr.bf16.mxu1 %v2580_v1  ;;  %2048 = vmatpush3.bf16.msra.mxu0 %v2047_v31  ;;  %v2056_v39 = vpack.c.bf16 %v235_v38, %v234_v37  ;;  %v237_v41 = vld [vmem:[#allocation5 + $0xd0] sm:$0xff]  ;;  %v238_v43 = vld [vmem:[#allocation5 + $0xd8] sm:$0xff]  ;;  %v239_v44 = vld [vmem:[#allocation5 + $0xe0] sm:$0xff] }
  0x42   :  { %2049 = vmatprep.subr.bf16.mxu0 %v2580_v1  ;;  %v2059_v42 = vpack.c.bf16 %v237_v41, %v236_v40  ;;  %v2062_v45 = vpack.c.bf16 %v239_v44, %v238_v43  ;;  %v240_v46 = vld [vmem:[#allocation5 + $0xe8] sm:$0xff]  ;;  %v241_v47 = vld [vmem:[#allocation5 + $0xf0] sm:$0xff]  ;;  %v242_v54 = vld [vmem:[#allocation5 + $0xf8] sm:$0xff] }
  0x43   :  { %v2065_v48 = vpack.c.bf16 %v241_v47, %v240_v46  ;;  %v1615_v49 = vld [vmem:[#allocation5 + $0x288] ss:$0 sm:$0xff]  ;;  %v243_v55 = vld [vmem:[#allocation5 + $0x100] sm:$0xff]  ;;  %v321_v57 = vld [vmem:[#allocation7 + $0x8] sm:$0xff] }
  0x44   :  { %2030 = vmatpush3.bf16.msra.mxu1 %v2029_v12  ;;  %v2068_v56 = vpack.c.bf16 %v243_v55, %v242_v54  ;;  %v324_v58 = vld [vmem:[#allocation7 + $0x20] sm:$0xff]  ;;  %v323_v61 = vld [vmem:[#allocation7 + $0x18] sm:$0xff]  ;;  %v330_v2 = vld [vmem:[#allocation7 + $0x50] sm:$0xff] }
  0x45   :  { %2031 = vmatprep.subr.bf16.mxu1 %v2580_v1  ;;  %2051 = vmatpush3.bf16.msra.mxu0 %v2050_v33  ;;  %v320_v59 = vld [vmem:[#allocation7] sm:$0xff]  ;;  %v2070_v60 = vpack.c.bf16 %v324_v58, %v321_v57  ;;  %v327_v63 = vld [vmem:[#allocation7 + $0x38] sm:$0xff]  ;;  %v326_v3 = vld [vmem:[#allocation7 + $0x30] sm:$0xff] }
  0x46   :  { %2052 = vmatprep.subr.bf16.mxu0 %v2580_v1  ;;  %v2072_v62 = vpack.c.bf16 %v323_v61, %v320_v59  ;;  %v2074_v4 = vpack.c.bf16 %v330_v2, %v327_v63  ;;  %v329_v5 = vld [vmem:[#allocation7 + $0x48] sm:$0xff]  ;;  %v336_v8 = vld [vmem:[#allocation7 + $0x80] sm:$0xff]  ;;  %v335_v11 = vld [vmem:[#allocation7 + $0x78] sm:$0xff] }
  0x47   :  { %v2076_v6 = vpack.c.bf16 %v329_v5, %v326_v3  ;;  %v333_v7 = vld [vmem:[#allocation7 + $0x68] sm:$0xff]  ;;  %v332_v10 = vld [vmem:[#allocation7 + $0x60] sm:$0xff]  ;;  %v322_v14 = vld [vmem:[#allocation7 + $0x10] sm:$0xff] }
  0x48   :  { %2033 = vmatpush3.bf16.msra.mxu1 %v2032_v15  ;;  %v2078_v9 = vpack.c.bf16 %v336_v8, %v333_v7  ;;  %v2080_v12 = vpack.c.bf16 %v335_v11, %v332_v10  ;;  %v1617_v13 = vld [vmem:[#allocation5 + $0x290] ss:$0 sm:$0xff]  ;;  %v331_v22 = vld [vmem:[#allocation7 + $0x58] sm:$0xff]  ;;  %v342_v28 = vld [vmem:[#allocation7 + $0xb0] sm:$0xff] }
  0x49   :  { %2034 = vmatprep.subr.bf16.mxu1 %v2580_v1  ;;  %2054 = vmatpush3.bf16.msra.mxu0 %v2053_v36  ;;  %v325_v15 = vld [vmem:[#allocation7 + $0x28] sm:$0xff]  ;;  %v338_v30 = vld [vmem:[#allocation7 + $0x90] sm:$0xff]  ;;  %v340_v32 = vld [vmem:[#allocation7 + $0xa0] sm:$0xff] }
  0x4a   :  { %2055 = vmatprep.subr.bf16.mxu0 %v2580_v1  ;;  %v2087_v19 = vpack.c.bf16 %v325_v15, %v322_v14  ;;  %v337_v25 = vld [vmem:[#allocation7 + $0x88] sm:$0xff]  ;;  %v343_v34 = vld [vmem:[#allocation7 + $0xb8] sm:$0xff]  ;;  %v514_v37 = vld [vmem:[#allocation7 + $0xe0] sm:$0xff] }
  0x4b   :  { %v341_v31 = vld [vmem:[#allocation7 + $0xa8] sm:$0xff]  ;;  %v2096_v35 = vpack.c.bf16 %v343_v34, %v340_v32  ;;  %v510_v43 = vld [vmem:[#allocation7 + $0xc0] sm:$0xff]  ;;  %v513_v44 = vld [vmem:[#allocation7 + $0xd8] sm:$0xff] }
  0x4c   :  { %2036 = vmatpush3.bf16.msra.mxu1 %v2035_v18  ;;  %v2084_v33 = vpack.c.bf16 %v341_v31, %v338_v30  ;;  %v511_v36 = vld [vmem:[#allocation7 + $0xc8] sm:$0xff]  ;;  %v512_v46 = vld [vmem:[#allocation7 + $0xd0] sm:$0xff]  ;;  %v2100_v54 = vpack.c.bf16 %v513_v44, %v510_v43  ;;  %v521_v63 = vld [vmem:[#allocation7 + $0x118] sm:$0xff] }
  0x4d   :  { %2037 = vmatprep.subr.bf16.mxu1 %v2580_v1  ;;  %2057 = vmatpush3.bf16.msra.mxu0 %v2056_v39  ;;  %v2098_v38 = vpack.c.bf16 %v514_v37, %v511_v36  ;;  %v560_v39 = vld [vmem:[#allocation7 + $0x250] sm:$0xff]  ;;  %v563_v40 = vld [vmem:[#allocation7 + $0x268] sm:$0xff]  ;;  %v526_v2 = vld [vmem:[#allocation7 + $0x140] sm:$0xff] }
  0x4e   :  { %2058 = vmatprep.subr.bf16.mxu0 %v2580_v1  ;;  %v2194_v41 = vpack.c.bf16 %v563_v40, %v560_v39  ;;  %v515_v47 = vld [vmem:[#allocation7 + $0xe8] sm:$0xff]  ;;  %v516_v55 = vld [vmem:[#allocation7 + $0xf0] sm:$0xff]  ;;  %v525_v7 = vld [vmem:[#allocation7 + $0x138] sm:$0xff] }
  0x4f   :  { %v2196_v57 = vpack.c.bf16 %v515_v47, %v512_v46  ;;  %v572_v3 = vld [vmem:[#allocation7 + $0x2b0] sm:$0xff]  ;;  %v529_v10 = vld [vmem:[#allocation7 + $0x158] sm:$0xff]  ;;  %v578_v15 = vld [vmem:[#allocation7 + $0x2e0] sm:$0xff] }
  0x50   :  { %2039 = vmatpush3.bf16.msra.mxu1 %v2038_v21  ;;  %v328_v21 = vld [vmem:[#allocation7 + $0x40] sm:$0xff]  ;;  %v532_v14 = vld [vmem:[#allocation7 + $0x170] sm:$0xff]  ;;  %v537_v31 = vld [vmem:[#allocation7 + $0x198] sm:$0xff] }
  0x51   :  { %2040 = vmatprep.subr.bf16.mxu1 %v2580_v1  ;;  %2060 = vmatpush3.bf16.msra.mxu0 %v2059_v42  ;;  %v2090_v23 = vpack.c.bf16 %v331_v22, %v328_v21  ;;  %v1618_v42 = vld [vmem:[#allocation5 + $0x298] ss:$0 sm:$0xff]  ;;  %v2110_v21 = vpack.c.bf16 %v532_v14, %v529_v10  ;;  %v535_v22 = vld [vmem:[#allocation7 + $0x188] sm:$0xff]  ;;  %v534_v30 = vld [vmem:[#allocation7 + $0x180] sm:$0xff] }
  0x52   :  { %2061 = vmatprep.subr.bf16.mxu0 %v2580_v1  ;;  %v541_v34 = vld [vmem:[#allocation7 + $0x1b8] sm:$0xff]  ;;  %v536_v36 = vld [vmem:[#allocation7 + $0x190] sm:$0xff]  ;;  %v539_v37 = vld [vmem:[#allocation7 + $0x1a8] sm:$0xff] }
  0x53   :  { %v590_v39 = vld [vmem:[#allocation7 + $0x340] sm:$0xff]  ;;  %v593_v40 = vld [vmem:[#allocation7 + $0x358] sm:$0xff]  ;;  %v543_v43 = vld [vmem:[#allocation7 + $0x1c8] sm:$0xff]  ;;  %v2212_v44 = vpack.c.bf16 %v539_v37, %v536_v36 }
  0x54   :  { %2042 = vmatpush3.bf16.msra.mxu1 %v2041_v24  ;;  %v334_v24 = vld [vmem:[#allocation7 + $0x70] sm:$0xff]  ;;  %v547_v46 = vld [vmem:[#allocation7 + $0x1e8] sm:$0xff]  ;;  %v2214_v47 = vpack.c.bf16 %v593_v40, %v590_v39  ;;  %v558_v10 = vld [vmem:[#allocation7 + $0x240] sm:$0xff] }
  0x55   :  { %2043 = vmatprep.subr.bf16.mxu1 %v2580_v1  ;;  %2063 = vmatpush3.bf16.msra.mxu0 %v2062_v45  ;;  %v2093_v26 = vpack.c.bf16 %v337_v25, %v334_v24  ;;  %v517_v45 = vld [vmem:[#allocation7 + $0xf8] sm:$0xff]  ;;  %v530_v24 = vld [vmem:[#allocation7 + $0x160] sm:$0xff]  ;;  %v592_v37 = vld [vmem:[#allocation7 + $0x350] sm:$0xff] }
  0x56   :  { %2064 = vmatprep.subr.bf16.mxu0 %v2580_v1  ;;  %v533_v25 = vld [vmem:[#allocation7 + $0x178] sm:$0xff]  ;;  %v588_v40 = vld [vmem:[#allocation7 + $0x330] sm:$0xff] }
  0x57   :  { %v2208_v32 = vpack.c.bf16 %v533_v25, %v530_v24  ;;  %v577_v24 = vld [vmem:[#allocation7 + $0x2d8] sm:$0xff]  ;;  %v580_v25 = vld [vmem:[#allocation7 + $0x2f0] sm:$0xff] }
  0x58   :  { %2045 = vmatpush3.bf16.msra.mxu1 %v2044_v27  ;;  %v339_v27 = vld [vmem:[#allocation7 + $0x98] sm:$0xff] }
  0x59   :  { %2066 = vmatpush3.bf16.msra.mxu0 %v2065_v48  ;;  %2071 = vmatprep.subr.bf16.mxu1 %v2070_v60  ;;  %v2082_v29 = vpack.c.bf16 %v342_v28, %v339_v27  ;;  %v523_v60 = vld [vmem:[#allocation7 + $0x128] sm:$0xff]  ;;  %v584_v27 = vld [vmem:[#allocation7 + $0x310] sm:$0xff]  ;;  %v589_v36 = vld [vmem:[#allocation7 + $0x338] sm:$0xff] }
  0x5a   :  { %2067 = vmatprep.subr.bf16.mxu0 %v2580_v1  ;;  %v587_v28 = vld [vmem:[#allocation7 + $0x328] sm:$0xff]  ;;  %v2150_v39 = vpack.c.bf16 %v592_v37, %v589_v36  ;;  %v621_v36 = vld [vmem:[#allocation7 + $0x438] sm:$0xff]  ;;  %v620_v37 = vld [vmem:[#allocation7 + $0x430] sm:$0xff] }
  0x5d   :  { %2069 = vmatpush3.bf16.msra.mxu0 %v2068_v56  ;;  %v519_v56 = vld [vmem:[#allocation7 + $0x108] sm:$0xff] }
  0x5e   :  { %2086 = vmatprep.subr.bf16.mxu0 %v2580_v1  ;;  %v2104_v5 = vpack.c.bf16 %v519_v56, %v516_v55 }
 0x10e   :  { %v131_v50 = vpop.f32.mrb[0].mxu0 }
 0x10f   :  { %v132_v51 = vadd.f32 %v1615_v49, %v131_v50  ;;  %v1827_v52 = vpop.f32.mrb[1].mxu0  ;;  %v520_v49 = vld [vmem:[#allocation7 + $0x110] sm:$0xff]  ;;  %v566_v50 = vld [vmem:[#allocation7 + $0x280] sm:$0xff] }
 0x110   :  { %v2102_v59 = vpack.c.bf16 %v520_v49, %v517_v45  ;;  %v545_v49 = vld [vmem:[#allocation7 + $0x1d8] sm:$0xff] }
 0x111   :  { %v135_v53 = vmax.f32 %v132_v51, 0.0  ;;  %v569_v51 = vld [vmem:[#allocation7 + $0x298] sm:$0xff] }
 0x112   :  { %v2198_v61 = vpack.c.bf16 %v569_v51, %v566_v50  ;;  %v550_v50 = vld [vmem:[#allocation7 + $0x200] sm:$0xff]  ;;  %v596_v51 = vld [vmem:[#allocation7 + $0x370] sm:$0xff] }
 0x113   :  { %1861 = vmatmul.mubr.f32.vlgmr.msra.gmra.mrb[0].mxu1 %v135_v53  ;;  %v2122_v56 = vpack.c.bf16 %v550_v50, %v547_v46  ;;  %v594_v46 = vld [vmem:[#allocation7 + $0x360] sm:$0xff]  ;;  %v604_v50 = vld [vmem:[#allocation7 + $0x3b0] sm:$0xff] }
 0x114   :  { %430 = vmatprep.mubr.f32.mxu1 %v2578_v0  ;;  %2073 = vmatpush1.bf16.msra.mxu1 %v2072_v62  ;;  %v518_v62 = vld [vmem:[#allocation7 + $0x100] sm:$0xff] }
 0x115   :  { %2075 = vmatprep.subr.bf16.mxu1 %v2074_v4  ;;  %v575_v4 = vld [vmem:[#allocation7 + $0x2c8] sm:$0xff]  ;;  %v2200_v8 = vpack.c.bf16 %v521_v63, %v518_v62  ;;  %v556_v62 = vld [vmem:[#allocation7 + $0x230] sm:$0xff] }
 0x116   :  { %v2202_v11 = vpack.c.bf16 %v575_v4, %v572_v3  ;;  %v552_v4 = vld [vmem:[#allocation7 + $0x210] sm:$0xff] }
 0x118   :  { %2077 = vmatpush1.bf16.msra.mxu1 %v2076_v6  ;;  %v522_v6 = vld [vmem:[#allocation7 + $0x120] sm:$0xff] }
 0x119   :  { %2079 = vmatprep.subr.bf16.mxu1 %v2078_v9  ;;  %v2106_v9 = vpack.c.bf16 %v526_v2, %v523_v60  ;;  %v551_v60 = vld [vmem:[#allocation7 + $0x208] sm:$0xff] }
 0x11c   :  { %2081 = vmatpush1.bf16.msra.mxu1 %v2080_v12  ;;  %v524_v12 = vld [vmem:[#allocation7 + $0x130] sm:$0xff] }
 0x11d   :  { %2083 = vmatprep.subr.bf16.mxu1 %v2082_v29 }
 0x120   :  { %2085 = vmatpush1.bf16.msra.mxu1 %v2084_v33 }
 0x121   :  { %2099 = vmatprep.subr.bf16.mxu1 %v2098_v38  ;;  %v544_v38 = vld [vmem:[#allocation7 + $0x1d0] sm:$0xff] }
 0x122   :  { %v2118_v45 = vpack.c.bf16 %v544_v38, %v541_v34  ;;  %v582_v34 = vld [vmem:[#allocation7 + $0x300] sm:$0xff] }
 0x1e6   :  { %v223_v16 = vpop.f32.mrb[0].mxu1 }
 0x1e7   :  { %v224_v17 = vadd.f32 %v1617_v13, %v223_v16  ;;  %v1862_v18 = vpop.f32.mrb[1].mxu1  ;;  %v527_v13 = vld [vmem:[#allocation7 + $0x148] sm:$0xff]  ;;  %v581_v16 = vld [vmem:[#allocation7 + $0x2f8] sm:$0xff] }
 0x1e8   :  { %v528_v18 = vld [vmem:[#allocation7 + $0x150] sm:$0xff] }
 0x1e9   :  { %v227_v20 = vmax.f32 %v224_v17, 0.0  ;;  %v2108_v17 = vpack.c.bf16 %v525_v7, %v522_v6  ;;  %v559_v6 = vld [vmem:[#allocation7 + $0x248] sm:$0xff]  ;;  %v562_v7 = vld [vmem:[#allocation7 + $0x260] sm:$0xff] }
 0x1eb   :  { %1896 = vmatmul.mubr.f32.vlgmr.msra.gmra.mrb[2].mxu0 %v227_v20  ;;  %v2204_v20 = vpack.c.bf16 %v527_v13, %v524_v12  ;;  %v565_v12 = vld [vmem:[#allocation7 + $0x278] sm:$0xff]  ;;  %v568_v13 = vld [vmem:[#allocation7 + $0x290] sm:$0xff] }
 0x1ec   :  { %2088 = vmatpush3.bf16.msra.mxu0 %v2087_v19  ;;  %1914 = vmatprep.mubr.msk.f32.mxu0 %vm2579_vm0, %v2578_v0  ;;  %v531_v19 = vld [vmem:[#allocation7 + $0x168] sm:$0xff] }
 0x1ed   :  { %2089 = vmatprep.subr.bf16.mxu0 %v2580_v1  ;;  %v2112_v29 = vpack.c.bf16 %v531_v19, %v528_v18  ;;  %v571_v18 = vld [vmem:[#allocation7 + $0x2a8] sm:$0xff]  ;;  %v574_v19 = vld [vmem:[#allocation7 + $0x2c0] sm:$0xff] }
 0x1f0   :  { %2091 = vmatpush3.bf16.msra.mxu0 %v2090_v23  ;;  %v2206_v23 = vpack.c.bf16 %v581_v16, %v578_v15  ;;  %v2134_v15 = vpack.c.bf16 %v568_v13, %v565_v12  ;;  %v564_v16 = vld [vmem:[#allocation7 + $0x270] sm:$0xff] }
 0x1f1   :  { %2092 = vmatprep.subr.bf16.mxu0 %v2580_v1 }
 0x1f4   :  { %2094 = vmatpush3.bf16.msra.mxu0 %v2093_v26  ;;  %v538_v26 = vld [vmem:[#allocation7 + $0x1a0] sm:$0xff] }
 0x1f5   :  { %2095 = vmatprep.subr.bf16.mxu0 %v2580_v1  ;;  %v2114_v33 = vpack.c.bf16 %v538_v26, %v535_v22  ;;  %v570_v22 = vld [vmem:[#allocation7 + $0x2a0] sm:$0xff] }
 0x1f8   :  { %2097 = vmatpush3.bf16.msra.mxu0 %v2096_v35  ;;  %v2210_v35 = vpack.c.bf16 %v587_v28, %v584_v27  ;;  %v2142_v27 = vpack.c.bf16 %v580_v25, %v577_v24  ;;  %v576_v28 = vld [vmem:[#allocation7 + $0x2d0] sm:$0xff] }
 0x1f9   :  { %2195 = vmatprep.subr.bf16.mxu0 %v2194_v41  ;;  %v2116_v41 = vpack.c.bf16 %v537_v31, %v534_v30  ;;  %v583_v30 = vld [vmem:[#allocation7 + $0x308] sm:$0xff]  ;;  %v586_v31 = vld [vmem:[#allocation7 + $0x320] sm:$0xff]  ;;  %v612_v24 = vld [vmem:[#allocation7 + $0x3f0] sm:$0xff] }
 0x2be   :  { %v315_v48 = vpop.f32.mrb[2].mxu0 }
 0x2bf   :  { %v316_v52 = vadd.f32 %v1618_v42, %v315_v48  ;;  %v1897_v53 = vpop.f32.mrb[3].mxu0  ;;  %v540_v42 = vld [vmem:[#allocation7 + $0x1b0] sm:$0xff]  ;;  %v542_v48 = vld [vmem:[#allocation7 + $0x1c0] sm:$0xff] }
 0x2c0   :  { %v2120_v53 = vpack.c.bf16 %v543_v43, %v540_v42  ;;  %v2216_v55 = vpack.c.bf16 %v545_v49, %v542_v48  ;;  %v595_v42 = vld [vmem:[#allocation7 + $0x368] sm:$0xff]  ;;  %v598_v43 = vld [vmem:[#allocation7 + $0x380] sm:$0xff]  ;;  %v601_v49 = vld [vmem:[#allocation7 + $0x398] sm:$0xff] }
 0x2c1   :  { %v319_v58 = vmax.f32 %v316_v52, 0.0  ;;  %v599_v52 = vld [vmem:[#allocation7 + $0x388] sm:$0xff] }
 0x2c3   :  { %1619 = vmatmul.mubr.msk.f32.vlgmr.msra.gmra.mrb[2].mxu1 %vm362_vm2, %v319_v58  ;;  %1915 = vmatmul.mubr.msk.f32.vlgmr.msra.gmra.mrb[4].mxu0 %vm362_vm2, %v319_v58  ;;  %v2218_v58 = vpack.c.bf16 %v599_v52, %v596_v51  ;;  %v602_v51 = vld [vmem:[#allocation7 + $0x3a0] sm:$0xff]  ;;  %v2158_v52 = vpack.c.bf16 %v604_v50, %v601_v49 }
 0x2c4   :  { %2101 = vmatpush1.bf16.msra.mxu1 %v2100_v54  ;;  %2197 = vmatpush3.bf16.msra.mxu0 %v2196_v57  ;;  %v546_v54 = vld [vmem:[#allocation7 + $0x1e0] sm:$0xff]  ;;  %v549_v57 = vld [vmem:[#allocation7 + $0x1f8] sm:$0xff] }
 0x2c5   :  { %2103 = vmatprep.subr.bf16.mxu1 %v2102_v59  ;;  %2199 = vmatprep.subr.bf16.mxu0 %v2198_v61  ;;  %v548_v59 = vld [vmem:[#allocation7 + $0x1f0] sm:$0xff]  ;;  %v553_v61 = vld [vmem:[#allocation7 + $0x218] sm:$0xff]  ;;  %v2124_v63 = vpack.c.bf16 %v549_v57, %v546_v54  ;;  %v634_v49 = vld [vmem:[#allocation7 + $0x4a0] sm:$0xff] }
 0x2c6   :  { %v2220_v2 = vpack.c.bf16 %v551_v60, %v548_v59  ;;  %v2126_v3 = vpack.c.bf16 %v556_v62, %v553_v61  ;;  %v600_v54 = vld [vmem:[#allocation7 + $0x390] sm:$0xff]  ;;  %v557_v59 = vld [vmem:[#allocation7 + $0x238] sm:$0xff]  ;;  %v607_v61 = vld [vmem:[#allocation7 + $0x3c8] sm:$0xff] }
 0x2c7   :  { %v610_v62 = vld [vmem:[#allocation7 + $0x3e0] sm:$0xff] }
 0x2c8   :  { %2105 = vmatpush1.bf16.msra.mxu1 %v2104_v5  ;;  %2201 = vmatpush3.bf16.msra.mxu0 %v2200_v8  ;;  %v555_v5 = vld [vmem:[#allocation7 + $0x228] sm:$0xff] }
 0x2c9   :  { %2107 = vmatprep.subr.bf16.mxu1 %v2106_v9  ;;  %2203 = vmatprep.subr.bf16.mxu0 %v2202_v11  ;;  %v2128_v8 = vpack.c.bf16 %v555_v5, %v552_v4  ;;  %v2130_v9 = vpack.c.bf16 %v562_v7, %v559_v6  ;;  %v561_v11 = vld [vmem:[#allocation7 + $0x258] sm:$0xff]  ;;  %v2674_v5 = vld [vmem:[#allocation7 + $0x9c0] ss:$8 sm:$0x7] }
 0x2ca   :  { %v2132_v14 = vpack.c.bf16 %v561_v11, %v558_v10  ;;  %v606_v11 = vld [vmem:[#allocation7 + $0x3c0] sm:$0xff] }
 0x2cc   :  { %2109 = vmatpush1.bf16.msra.mxu1 %v2108_v17  ;;  %2205 = vmatpush3.bf16.msra.mxu0 %v2204_v20  ;;  %v567_v17 = vld [vmem:[#allocation7 + $0x288] sm:$0xff] }
 0x2cd   :  { %2111 = vmatprep.subr.bf16.mxu1 %v2110_v21  ;;  %2207 = vmatprep.subr.bf16.mxu0 %v2206_v23  ;;  %v2136_v20 = vpack.c.bf16 %v567_v17, %v564_v16  ;;  %v2138_v21 = vpack.c.bf16 %v574_v19, %v571_v18  ;;  %v573_v23 = vld [vmem:[#allocation7 + $0x2b8] sm:$0xff]  ;;  %v608_v16 = vld [vmem:[#allocation7 + $0x3d0] sm:$0xff]  ;;  %v611_v17 = vld [vmem:[#allocation7 + $0x3e8] sm:$0xff] }
 0x2ce   :  { %v2140_v26 = vpack.c.bf16 %v573_v23, %v570_v22  ;;  %v613_v19 = vld [vmem:[#allocation7 + $0x3f8] sm:$0xff]  ;;  %v2227_v23 = vpack.c.bf16 %v611_v17, %v608_v16  ;;  %v644_v17 = vld [vmem:[#allocation7 + $0x4f0] sm:$0xff] }
 0x2cf   :  { %v645_v16 = vld [vmem:[#allocation7 + $0x4f8] sm:$0xff] }
 0x2d0   :  { %2113 = vmatpush1.bf16.msra.mxu1 %v2112_v29  ;;  %2209 = vmatpush3.bf16.msra.mxu0 %v2208_v32  ;;  %v579_v29 = vld [vmem:[#allocation7 + $0x2e8] sm:$0xff] }
 0x2d1   :  { %2115 = vmatprep.subr.bf16.mxu1 %v2114_v33  ;;  %2211 = vmatprep.subr.bf16.mxu0 %v2210_v35  ;;  %v2144_v32 = vpack.c.bf16 %v579_v29, %v576_v28  ;;  %v2146_v33 = vpack.c.bf16 %v586_v31, %v583_v30  ;;  %v585_v35 = vld [vmem:[#allocation7 + $0x318] sm:$0xff]  ;;  %v614_v28 = vld [vmem:[#allocation7 + $0x400] sm:$0xff]  ;;  %v619_v30 = vld [vmem:[#allocation7 + $0x428] sm:$0xff] }
 0x2d2   :  { %v2148_v38 = vpack.c.bf16 %v585_v35, %v582_v34  ;;  %v617_v29 = vld [vmem:[#allocation7 + $0x418] sm:$0xff]  ;;  %v622_v31 = vld [vmem:[#allocation7 + $0x440] sm:$0xff] }
 0x2d3   :  { %v618_v34 = vld [vmem:[#allocation7 + $0x420] sm:$0xff]  ;;  %v2170_v35 = vpack.c.bf16 %v622_v31, %v619_v30 }
 0x2d4   :  { %2117 = vmatpush1.bf16.msra.mxu1 %v2116_v41  ;;  %2213 = vmatpush3.bf16.msra.mxu0 %v2212_v44  ;;  %v591_v41 = vld [vmem:[#allocation7 + $0x348] sm:$0xff] }
 0x2d5   :  { %2119 = vmatprep.subr.bf16.mxu1 %v2118_v45  ;;  %2215 = vmatprep.subr.bf16.mxu0 %v2214_v47  ;;  %v2152_v44 = vpack.c.bf16 %v591_v41, %v588_v40  ;;  %v2154_v45 = vpack.c.bf16 %v598_v43, %v595_v42  ;;  %v597_v47 = vld [vmem:[#allocation7 + $0x378] sm:$0xff]  ;;  %v628_v40 = vld [vmem:[#allocation7 + $0x470] sm:$0xff]  ;;  %v2172_v41 = vpack.c.bf16 %v621_v36, %v618_v34 }
 0x2d6   :  { %v2156_v48 = vpack.c.bf16 %v597_v47, %v594_v46  ;;  %v624_v43 = vld [vmem:[#allocation7 + $0x450] sm:$0xff]  ;;  %v626_v46 = vld [vmem:[#allocation7 + $0x460] sm:$0xff]  ;;  %v629_v47 = vld [vmem:[#allocation7 + $0x478] sm:$0xff] }
 0x2d7   :  { %v960_v34 = vld [vmem:[#allocation7 + $0x558] sm:$0xff]  ;;  %v967_v36 = vld [vmem:[#allocation7 + $0x590] sm:$0xff] }
 0x2d8   :  { %2121 = vmatpush1.bf16.msra.mxu1 %v2120_v53  ;;  %2217 = vmatpush3.bf16.msra.mxu0 %v2216_v55  ;;  %v605_v53 = vld [vmem:[#allocation7 + $0x3b8] sm:$0xff]  ;;  %v603_v55 = vld [vmem:[#allocation7 + $0x3a8] sm:$0xff] }
 0x2d9   :  { %2123 = vmatprep.subr.bf16.mxu1 %v2122_v56  ;;  %2219 = vmatprep.subr.bf16.mxu0 %v2218_v58  ;;  %v2222_v56 = vpack.c.bf16 %v605_v53, %v602_v51  ;;  %v2160_v57 = vpack.c.bf16 %v603_v55, %v600_v54  ;;  %v554_v58 = vld [vmem:[#allocation7 + $0x220] sm:$0xff]  ;;  %v2236_v51 = vpack.c.bf16 %v629_v47, %v626_v46  ;;  %v633_v54 = vld [vmem:[#allocation7 + $0x498] sm:$0xff]  ;;  %v632_v55 = vld [vmem:[#allocation7 + $0x490] sm:$0xff] }
 0x2da   :  { %v2224_v60 = vpack.c.bf16 %v557_v59, %v554_v58  ;;  %v640_v58 = vld [vmem:[#allocation7 + $0x4d0] sm:$0xff]  ;;  %v972_v46 = vld [vmem:[#allocation7 + $0x5b8] sm:$0xff] }
 0x2db   :  { %v976_v47 = vld [vmem:[#allocation7 + $0x5d8] sm:$0xff] }
 0x2dc   :  { %2125 = vmatpush1.bf16.msra.mxu1 %v2124_v63  ;;  %2221 = vmatpush3.bf16.msra.mxu0 %v2220_v2  ;;  %v2162_v63 = vpack.c.bf16 %v610_v62, %v607_v61  ;;  %v347_v2 = vlaneseq  ;;  %v636_v61 = vld [vmem:[#allocation7 + $0x4b0] sm:$0xff] }
 0x2dd   :  { %2127 = vmatprep.subr.bf16.mxu1 %v2126_v3  ;;  %2223 = vmatprep.subr.bf16.mxu0 %v2222_v56  ;;  %v635_v56 = vld [vmem:[#allocation7 + $0x4a8] sm:$0xff] }
 0x2de   :  { %v2669_v3 = vshrl.u32 %v347_v2, 7  ;;  %v638_v2 = vld [vmem:[#allocation7 + $0x4c0] sm:$0xff] }
 0x2e0   :  { %2129 = vmatpush1.bf16.msra.mxu1 %v2128_v8  ;;  %2225 = vmatpush3.bf16.msra.mxu0 %v2224_v60  ;;  %v2672_v4 = vsub.s32 0, %v2669_v3  ;;  %v2677_v6 = vsub.s32 1, %v2669_v3  ;;  %v2239_v60 = vpack.c.bf16 %v635_v56, %v632_v55 }
 0x2e1   :  { %2131 = vmatprep.subr.bf16.mxu1 %v2130_v9  ;;  %2226 = vmatprep.subr.bf16.mxu0 %v2580_v1 }
 0x2e2   :  { %v350_v7 = vrot.slane %v2674_v5, %v2672_v4  ;;  %v354_v8 = vrot.slane %v2674_v5, %v2677_v6 }
 0x2e4   :  { %2133 = vmatpush1.bf16.msra.mxu1 %v2132_v14 }
 0x2e5   :  { %2135 = vmatprep.subr.bf16.mxu1 %v2134_v15  ;;  %v609_v15 = vld [vmem:[#allocation7 + $0x3d8] sm:$0xff] }
 0x2e6   :  { %v2164_v22 = vpack.c.bf16 %v609_v15, %v606_v11 }
 0x2e8   :  { %2137 = vmatpush1.bf16.msra.mxu1 %v2136_v20  ;;  %v616_v20 = vld [vmem:[#allocation7 + $0x410] sm:$0xff] }
 0x2e9   :  { %2139 = vmatprep.subr.bf16.mxu1 %v2138_v21 }
 0x2ec   :  { %2141 = vmatpush1.bf16.msra.mxu1 %v2140_v26  ;;  %v2166_v26 = vpack.c.bf16 %v616_v20, %v613_v19  ;;  %v649_v19 = vld [vmem:[#allocation7 + $0x518] sm:$0xff]  ;;  %v652_v20 = vld [vmem:[#allocation7 + $0x530] sm:$0xff] }
 0x2ed   :  { %2143 = vmatprep.subr.bf16.mxu1 %v2142_v27  ;;  %v615_v27 = vld [vmem:[#allocation7 + $0x408] sm:$0xff] }
 0x2f0   :  { %2145 = vmatpush1.bf16.msra.mxu1 %v2144_v32  ;;  %v2168_v32 = vpack.c.bf16 %v615_v27, %v612_v24  ;;  %v653_v27 = vld [vmem:[#allocation7 + $0x538] sm:$0xff] }
 0x2f1   :  { %2147 = vmatprep.subr.bf16.mxu1 %v2146_v33  ;;  %v2230_v33 = vpack.c.bf16 %v617_v29, %v614_v28  ;;  %v958_v28 = vld [vmem:[#allocation7 + $0x548] sm:$0xff]  ;;  %v961_v29 = vld [vmem:[#allocation7 + $0x560] sm:$0xff] }
 0x2f4   :  { %2149 = vmatpush1.bf16.msra.mxu1 %v2148_v38  ;;  %v623_v38 = vld [vmem:[#allocation7 + $0x448] sm:$0xff] }
 0x2f5   :  { %2151 = vmatprep.subr.bf16.mxu1 %v2150_v39  ;;  %v625_v39 = vld [vmem:[#allocation7 + $0x458] sm:$0xff]  ;;  %v2233_v42 = vpack.c.bf16 %v623_v38, %v620_v37 }
 0x2f8   :  { %2153 = vmatpush1.bf16.msra.mxu1 %v2152_v44  ;;  %v2174_v44 = vpack.c.bf16 %v628_v40, %v625_v39  ;;  %v963_v40 = vld [vmem:[#allocation7 + $0x570] sm:$0xff] }
 0x2f9   :  { %2155 = vmatprep.subr.bf16.mxu1 %v2154_v45  ;;  %v627_v45 = vld [vmem:[#allocation7 + $0x468] sm:$0xff] }
 0x2fa   :  { %v2176_v50 = vpack.c.bf16 %v627_v45, %v624_v43  ;;  %v973_v43 = vld [vmem:[#allocation7 + $0x5c0] sm:$0xff] }
 0x2fb   :  { %v969_v45 = vld [vmem:[#allocation7 + $0x5a0] sm:$0xff] }
 0x2fc   :  { %2157 = vmatpush1.bf16.msra.mxu1 %v2156_v48  ;;  %v631_v48 = vld [vmem:[#allocation7 + $0x488] sm:$0xff] }
 0x2fd   :  { %2159 = vmatprep.subr.bf16.mxu1 %v2158_v52  ;;  %v630_v52 = vld [vmem:[#allocation7 + $0x480] sm:$0xff]  ;;  %v2178_v53 = vpack.c.bf16 %v634_v49, %v631_v48  ;;  %v979_v48 = vld [vmem:[#allocation7 + $0x5f0] sm:$0xff]  ;;  %v2260_v49 = vpack.c.bf16 %v972_v46, %v969_v45 }
 0x2fe   :  { %v2180_v59 = vpack.c.bf16 %v633_v54, %v630_v52  ;;  %v978_v52 = vld [vmem:[#allocation7 + $0x5e8] sm:$0xff]  ;;  %v985_v54 = vld [vmem:[#allocation7 + $0x620] sm:$0xff]  ;;  %v1019_v46 = vld [vmem:[#allocation7 + $0x730] sm:$0xff] }
 0x300   :  { %2161 = vmatpush1.bf16.msra.mxu1 %v2160_v57  ;;  %v637_v57 = vld [vmem:[#allocation7 + $0x4b8] sm:$0xff] }
 0x301   :  { %2163 = vmatprep.subr.bf16.mxu1 %v2162_v63  ;;  %v2182_v62 = vpack.c.bf16 %v640_v58, %v637_v57  ;;  %v639_v63 = vld [vmem:[#allocation7 + $0x4c8] sm:$0xff]  ;;  %v981_v57 = vld [vmem:[#allocation7 + $0x600] sm:$0xff]  ;;  %v984_v58 = vld [vmem:[#allocation7 + $0x618] sm:$0xff] }
 0x302   :  { %v2184_v11 = vpack.c.bf16 %v639_v63, %v636_v61  ;;  %v2268_v61 = vpack.c.bf16 %v984_v58, %v981_v57  ;;  %v987_v63 = vld [vmem:[#allocation7 + $0x630] sm:$0xff]  ;;  %v1028_v58 = vld [vmem:[#allocation7 + $0x778] sm:$0xff] }
 0x396   :  { %v432_v9 = vpop.f32.mrb[2].mxu1  ;;  %v2683_v10 = vpop.f32.mrb[4].mxu0 }
 0x397   :  { %v433_v12 = vadd.f32 %v432_v9, %v350_v7  ;;  %v434_v13 = vpop.f32.mrb[3].mxu1  ;;  %v1916_v14 = vpop.f32.mrb[5].mxu0  ;;  %v641_v7 = vld [vmem:[#allocation7 + $0x4d8] sm:$0xff]  ;;  %v646_v9 = vld [vmem:[#allocation7 + $0x500] sm:$0xff] }
 0x398   :  { %v435_v18 = vadd.f32 %v434_v13, %v354_v8  ;;  %v643_v8 = vld [vmem:[#allocation7 + $0x4e8] sm:$0xff]  ;;  %v642_v13 = vld [vmem:[#allocation7 + $0x4e0] sm:$0xff]  ;;  %v2693_v14 = vsub.s32 2, %v2669_v3  ;;  %v2190_v3 = vpack.c.bf16 %v652_v20, %v649_v19  ;;  %v999_v19 = vld [vmem:[#allocation7 + $0x690] sm:$0xff] }
 0x399   :  { %v507_v25 = vmax.f32 %v433_v12, 0.0  ;;  %v2242_v12 = vpack.c.bf16 %v641_v7, %v638_v2  ;;  %v2186_v15 = vpack.c.bf16 %v646_v9, %v643_v8  ;;  %v990_v2 = vld [vmem:[#allocation7 + $0x648] sm:$0xff]  ;;  %v997_v8 = vld [vmem:[#allocation7 + $0x680] sm:$0xff] }
 0x39a   :  { %v508_v21 = vmax.f32 %v435_v18, 0.0  ;;  %v647_v18 = vld [vmem:[#allocation7 + $0x508] sm:$0xff]  ;;  %v358_v24 = vrot.slane %v2674_v5, %v2693_v14  ;;  %v957_v5 = vld [vmem:[#allocation7 + $0x540] sm:$0xff]  ;;  %v2272_v9 = vpack.c.bf16 %v990_v2, %v987_v63  ;;  %v980_v2 = vld [vmem:[#allocation7 + $0x5f8] sm:$0xff] }
 0x39b   :  { %v2252_v37 = vpack.c.bf16 %v960_v34, %v957_v5  ;;  %v994_v7 = vld [vmem:[#allocation7 + $0x668] sm:$0xff]  ;;  %v1015_v5 = vld [vmem:[#allocation7 + $0x710] sm:$0xff]  ;;  %v1013_v34 = vld [vmem:[#allocation7 + $0x700] sm:$0xff] }
 0x39c   :  { %736 = vmatprep.mubr.f32.mxu1 %v508_v21  ;;  %878 = vmatprep.mubr.f32.mxu0 %v508_v21  ;;  %v2188_v21 = vpack.c.bf16 %v645_v16, %v642_v13  ;;  %v996_v13 = vld [vmem:[#allocation7 + $0x678] sm:$0xff]  ;;  %v1002_v20 = vld [vmem:[#allocation7 + $0x6a8] sm:$0xff]  ;;  %v977_v63 = vld [vmem:[#allocation7 + $0x5e0] sm:$0xff] }
 0x39d   :  { %737 = vmatmul.mubr.f32.vlgmr.msra.gmra.mrb[4].mxu1 %v507_v25  ;;  %879 = vmatmul.mubr.f32.vlgmr.msra.gmra.mrb[6].mxu0 %v507_v25  ;;  %v651_v25 = vld [vmem:[#allocation7 + $0x528] sm:$0xff]  ;;  %v1000_v16 = vld [vmem:[#allocation7 + $0x698] sm:$0xff] }
 0x39e   :  { %2165 = vmatpush1.bf16.msra.mxu1 %v2164_v22  ;;  %2228 = vmatpush3.bf16.msra.mxu0 %v2227_v23  ;;  %v2245_v22 = vpack.c.bf16 %v647_v18, %v644_v17  ;;  %v648_v23 = vld [vmem:[#allocation7 + $0x510] sm:$0xff] }
 0x39f   :  { %2167 = vmatprep.subr.bf16.mxu1 %v2166_v26  ;;  %2229 = vmatprep.subr.bf16.mxu0 %v2580_v1  ;;  %v650_v26 = vld [vmem:[#allocation7 + $0x520] sm:$0xff]  ;;  %v2192_v30 = vpack.c.bf16 %v651_v25, %v648_v23  ;;  %v1003_v17 = vld [vmem:[#allocation7 + $0x6b0] sm:$0xff]  ;;  %v1010_v25 = vld [vmem:[#allocation7 + $0x6e8] sm:$0xff] }
 0x3a0   :  { %807 = vmatprep.mubr.f32.mxu1 %v2578_v0  ;;  %1949 = vmatprep.mubr.msk.f32.mxu0 %vm2579_vm0, %v2578_v0  ;;  %v2248_v31 = vpack.c.bf16 %v653_v27, %v650_v26  ;;  %v2278_v18 = vpack.c.bf16 %v1003_v17, %v1000_v16  ;;  %v1009_v23 = vld [vmem:[#allocation7 + $0x6e0] sm:$0xff]  ;;  %v1008_v27 = vld [vmem:[#allocation7 + $0x6d8] sm:$0xff] }
 0x3a1   :  { %v1005_v26 = vld [vmem:[#allocation7 + $0x6c0] sm:$0xff]  ;;  %v1032_v16 = vld [vmem:[#allocation7 + $0x798] sm:$0xff] }
 0x3a2   :  { %2169 = vmatpush1.bf16.msra.mxu1 %v2168_v32  ;;  %2231 = vmatpush3.bf16.msra.mxu0 %v2230_v33  ;;  %v504_v32 = vadd.f32 %v2683_v10, %v358_v24  ;;  %v2250_v33 = vpack.c.bf16 %v961_v29, %v958_v28  ;;  %v1007_v24 = vld [vmem:[#allocation7 + $0x6d0] sm:$0xff]  ;;  %v2284_v29 = vpack.c.bf16 %v1008_v27, %v1005_v26  ;;  %v1038_v27 = vld [vmem:[#allocation7 + $0x7c8] sm:$0xff] }
 0x3a3   :  { %2171 = vmatprep.subr.bf16.mxu1 %v2170_v35  ;;  %2232 = vmatprep.subr.bf16.mxu0 %v2580_v1  ;;  %v964_v35 = vld [vmem:[#allocation7 + $0x578] sm:$0xff]  ;;  %v2346_v28 = vpack.c.bf16 %v1010_v25, %v1007_v24  ;;  %v1035_v26 = vld [vmem:[#allocation7 + $0x7b0] sm:$0xff] }
 0x3a4   :  { %v509_v38 = vmax.f32 %v504_v32, 0.0  ;;  %v2254_v39 = vpack.c.bf16 %v967_v36, %v964_v35  ;;  %v1012_v32 = vld [vmem:[#allocation7 + $0x6f8] sm:$0xff] }
 0x3a5   :  { %v1016_v35 = vld [vmem:[#allocation7 + $0x718] sm:$0xff]  ;;  %v2286_v36 = vpack.c.bf16 %v1015_v5, %v1012_v32  ;;  %v1042_v32 = vld [vmem:[#allocation7 + $0x7e8] sm:$0xff]  ;;  %v1043_v5 = vld [vmem:[#allocation7 + $0x7f0] sm:$0xff] }
 0x3a6   :  { %2173 = vmatpush1.bf16.msra.mxu1 %v2172_v41  ;;  %2234 = vmatpush3.bf16.msra.mxu0 %v2233_v42  ;;  %v966_v41 = vld [vmem:[#allocation7 + $0x588] sm:$0xff]  ;;  %v1040_v24 = vld [vmem:[#allocation7 + $0x7d8] sm:$0xff] }
 0x3a7   :  { %2175 = vmatprep.subr.bf16.mxu1 %v2174_v44  ;;  %2235 = vmatprep.subr.bf16.mxu0 %v2580_v1  ;;  %v970_v42 = vld [vmem:[#allocation7 + $0x5a8] sm:$0xff]  ;;  %v2256_v10 = vpack.c.bf16 %v966_v41, %v963_v40  ;;  %v965_v40 = vld [vmem:[#allocation7 + $0x580] sm:$0xff] }
 0x3a8   :  { %v2258_v44 = vpack.c.bf16 %v973_v43, %v970_v42  ;;  %v968_v42 = vld [vmem:[#allocation7 + $0x598] sm:$0xff]  ;;  %v1018_v43 = vld [vmem:[#allocation7 + $0x728] sm:$0xff] }
 0x3aa   :  { %2177 = vmatpush1.bf16.msra.mxu1 %v2176_v50  ;;  %2237 = vmatpush3.bf16.msra.mxu0 %v2236_v51  ;;  %v2262_v50 = vpack.c.bf16 %v979_v48, %v976_v47  ;;  %v975_v51 = vld [vmem:[#allocation7 + $0x5d0] sm:$0xff]  ;;  %v1022_v47 = vld [vmem:[#allocation7 + $0x748] sm:$0xff]  ;;  %v1017_v48 = vld [vmem:[#allocation7 + $0x720] sm:$0xff] }
 0x3ab   :  { %2179 = vmatprep.subr.bf16.mxu1 %v2178_v53  ;;  %2238 = vmatprep.subr.bf16.mxu0 %v2580_v1  ;;  %v982_v53 = vld [vmem:[#allocation7 + $0x608] sm:$0xff]  ;;  %v2264_v55 = vpack.c.bf16 %v978_v52, %v975_v51  ;;  %v971_v51 = vld [vmem:[#allocation7 + $0x5b0] sm:$0xff] }
 0x3ac   :  { %v2266_v56 = vpack.c.bf16 %v985_v54, %v982_v53  ;;  %v974_v52 = vld [vmem:[#allocation7 + $0x5c8] sm:$0xff]  ;;  %v1024_v53 = vld [vmem:[#allocation7 + $0x758] sm:$0xff]  ;;  %v1027_v54 = vld [vmem:[#allocation7 + $0x770] sm:$0xff] }
 0x3ad   :  { %v2356_v57 = vpack.c.bf16 %v974_v52, %v971_v51 }
 0x3ae   :  { %2181 = vmatpush1.bf16.msra.mxu1 %v2180_v59  ;;  %2240 = vmatpush3.bf16.msra.mxu0 %v2239_v60  ;;  %v988_v59 = vld [vmem:[#allocation7 + $0x638] sm:$0xff]  ;;  %v991_v60 = vld [vmem:[#allocation7 + $0x650] sm:$0xff] }
 0x3af   :  { %2183 = vmatprep.subr.bf16.mxu1 %v2182_v62  ;;  %2241 = vmatprep.subr.bf16.mxu0 %v2580_v1  ;;  %v2270_v62 = vpack.c.bf16 %v991_v60, %v988_v59  ;;  %v1023_v59 = vld [vmem:[#allocation7 + $0x750] sm:$0xff]  ;;  %v1026_v60 = vld [vmem:[#allocation7 + $0x768] sm:$0xff] }
 0x3b2   :  { %2185 = vmatpush1.bf16.msra.mxu1 %v2184_v11  ;;  %2243 = vmatpush3.bf16.msra.mxu0 %v2242_v12  ;;  %v2274_v11 = vpack.c.bf16 %v997_v8, %v994_v7  ;;  %v993_v12 = vld [vmem:[#allocation7 + $0x660] sm:$0xff]  ;;  %v1030_v7 = vld [vmem:[#allocation7 + $0x788] sm:$0xff] }
 0x3b3   :  { %2187 = vmatprep.subr.bf16.mxu1 %v2186_v15  ;;  %2244 = vmatprep.subr.bf16.mxu0 %v2580_v1  ;;  %v2276_v15 = vpack.c.bf16 %v996_v13, %v993_v12  ;;  %v1033_v8 = vld [vmem:[#allocation7 + $0x7a0] sm:$0xff]  ;;  %v2296_v12 = vpack.c.bf16 %v1026_v60, %v1023_v59  ;;  %v2360_v13 = vpack.c.bf16 %v980_v2, %v977_v63 }
 0x3b4   :  { %v2298_v17 = vpack.c.bf16 %v1033_v8, %v1030_v7 }
 0x3b6   :  { %2189 = vmatpush1.bf16.msra.mxu1 %v2188_v21  ;;  %2246 = vmatpush3.bf16.msra.mxu0 %v2245_v22  ;;  %v2280_v21 = vpack.c.bf16 %v1002_v20, %v999_v19  ;;  %v1006_v22 = vld [vmem:[#allocation7 + $0x6c8] sm:$0xff]  ;;  %v983_v19 = vld [vmem:[#allocation7 + $0x610] sm:$0xff] }
 0x3b7   :  { %2191 = vmatprep.subr.bf16.mxu1 %v2190_v3  ;;  %2247 = vmatprep.subr.bf16.mxu0 %v2580_v1  ;;  %v2282_v3 = vpack.c.bf16 %v1009_v23, %v1006_v22  ;;  %v986_v20 = vld [vmem:[#allocation7 + $0x628] sm:$0xff]  ;;  %v1039_v22 = vld [vmem:[#allocation7 + $0x7d0] sm:$0xff]  ;;  %v1037_v23 = vld [vmem:[#allocation7 + $0x7c0] sm:$0xff] }
 0x3b8   :  { %v2364_v25 = vpack.c.bf16 %v986_v20, %v983_v19  ;;  %v1055_v19 = vld [vmem:[#allocation7 + $0x850] sm:$0xff]  ;;  %v1058_v20 = vld [vmem:[#allocation7 + $0x868] sm:$0xff] }
 0x3ba   :  { %2193 = vmatpush1.bf16.msra.mxu1 %v2192_v30  ;;  %2249 = vmatpush3.bf16.msra.mxu0 %v2248_v31  ;;  %v959_v30 = vld [vmem:[#allocation7 + $0x550] sm:$0xff]  ;;  %v962_v31 = vld [vmem:[#allocation7 + $0x568] sm:$0xff] }
 0x3bb   :  { %2251 = vmatprep.subr.bf16.mxu0 %v2250_v33  ;;  %v2348_v33 = vpack.c.bf16 %v962_v31, %v959_v30  ;;  %2347 = vmatprep.subr.bf16.mxu1 %v2346_v28  ;;  %v989_v30 = vld [vmem:[#allocation7 + $0x640] sm:$0xff]  ;;  %v992_v31 = vld [vmem:[#allocation7 + $0x658] sm:$0xff] }
 0x3bd   :  { %808 = vmatmul.mubr.f32.vlgmr.msra.gmra.mrb[4].mxu1 %v509_v38  ;;  %1950 = vmatmul.mubr.f32.vlgmr.msra.gmra.mrb[8].mxu0 %v509_v38  ;;  %v1011_v38 = vld [vmem:[#allocation7 + $0x6f0] sm:$0xff] }
 0x3be   :  { %2253 = vmatpush1.bf16.msra.mxu0 %v2252_v37  ;;  %v2350_v37 = vpack.c.bf16 %v1016_v35, %v1013_v34  ;;  %2349 = vmatpush3.bf16.msra.mxu1 %v2348_v33  ;;  %v1045_v33 = vld [vmem:[#allocation7 + $0x800] sm:$0xff]  ;;  %v1046_v34 = vld [vmem:[#allocation7 + $0x808] sm:$0xff]  ;;  %v2304_v35 = vpack.c.bf16 %v1038_v27, %v1035_v26  ;;  %v1059_v26 = vld [vmem:[#allocation7 + $0x870] sm:$0xff] }
 0x3bf   :  { %2255 = vmatprep.subr.bf16.mxu0 %v2254_v39  ;;  %v1014_v39 = vld [vmem:[#allocation7 + $0x708] sm:$0xff] }
 0x3c0   :  { %v2288_v41 = vpack.c.bf16 %v1014_v39, %v1011_v38  ;;  %2351 = vmatprep.subr.bf16.mxu1 %v2350_v37  ;;  %v1041_v37 = vld [vmem:[#allocation7 + $0x7e0] sm:$0xff]  ;;  %v2306_v38 = vpack.c.bf16 %v1045_v33, %v1042_v32  ;;  %v2370_v39 = vpack.c.bf16 %v1046_v34, %v1043_v5  ;;  %v1066_v32 = vld [vmem:[#allocation7 + $0x8a8] sm:$0xff] }
 0x3c1   :  { %v1069_v33 = vld [vmem:[#allocation7 + $0x8c0] sm:$0xff] }
 0x3c2   :  { %2257 = vmatpush1.bf16.msra.mxu0 %v2256_v10  ;;  %v1021_v10 = vld [vmem:[#allocation7 + $0x740] sm:$0xff] }
 0x3c3   :  { %2259 = vmatprep.subr.bf16.mxu0 %v2258_v44  ;;  %v2352_v44 = vpack.c.bf16 %v968_v42, %v965_v40  ;;  %v2290_v45 = vpack.c.bf16 %v1021_v10, %v1018_v43  ;;  %v1044_v40 = vld [vmem:[#allocation7 + $0x7f8] sm:$0xff]  ;;  %v998_v42 = vld [vmem:[#allocation7 + $0x688] sm:$0xff] }
 0x3c4   :  { %v2308_v43 = vpack.c.bf16 %v1044_v40, %v1041_v37  ;;  %v1068_v37 = vld [vmem:[#allocation7 + $0x8b8] sm:$0xff] }
 0x3c5   :  { %2353 = vmatpush3.bf16.msra.mxu1 %v2352_v44  ;;  %v1048_v44 = vld [vmem:[#allocation7 + $0x818] sm:$0xff] }
 0x3c6   :  { %2261 = vmatpush1.bf16.msra.mxu0 %v2260_v49  ;;  %v2354_v49 = vpack.c.bf16 %v1022_v47, %v1019_v46  ;;  %v1049_v46 = vld [vmem:[#allocation7 + $0x820] sm:$0xff]  ;;  %v1072_v40 = vld [vmem:[#allocation7 + $0x8d8] sm:$0xff] }
 0x3c7   :  { %2263 = vmatprep.subr.bf16.mxu0 %v2262_v50  ;;  %v1020_v50 = vld [vmem:[#allocation7 + $0x738] sm:$0xff] }
 0x3c8   :  { %2355 = vmatprep.subr.bf16.mxu1 %v2354_v49  ;;  %v1047_v49 = vld [vmem:[#allocation7 + $0x810] sm:$0xff] }
 0x3c9   :  { %2357 = vmatpush3.bf16.msra.mxu1 %v2356_v57  ;;  %v1057_v57 = vld [vmem:[#allocation7 + $0x860] sm:$0xff] }
 0x3ca   :  { %2265 = vmatpush1.bf16.msra.mxu0 %v2264_v55  ;;  %v1025_v55 = vld [vmem:[#allocation7 + $0x760] sm:$0xff] }
 0x3cb   :  { %2267 = vmatprep.subr.bf16.mxu0 %v2266_v56  ;;  %v2292_v56 = vpack.c.bf16 %v1020_v50, %v1017_v48  ;;  %v1052_v48 = vld [vmem:[#allocation7 + $0x838] sm:$0xff]  ;;  %v1050_v50 = vld [vmem:[#allocation7 + $0x828] sm:$0xff] }
 0x3cc   :  { %v2374_v51 = vpack.c.bf16 %v1052_v48, %v1049_v46  ;;  %v2312_v52 = vpack.c.bf16 %v1050_v50, %v1047_v49  ;;  %v1073_v46 = vld [vmem:[#allocation7 + $0x8e0] sm:$0xff]  ;;  %v1078_v48 = vld [vmem:[#allocation7 + $0x908] sm:$0xff] }
 0x3cd   :  { %v1081_v49 = vld [vmem:[#allocation7 + $0x920] sm:$0xff] }
 0x3ce   :  { %2269 = vmatpush1.bf16.msra.mxu0 %v2268_v61  ;;  %v2294_v61 = vpack.c.bf16 %v1027_v54, %v1024_v53  ;;  %v1001_v53 = vld [vmem:[#allocation7 + $0x6a0] sm:$0xff]  ;;  %v1004_v54 = vld [vmem:[#allocation7 + $0x6b8] sm:$0xff] }
 0x3cf   :  { %2271 = vmatprep.subr.bf16.mxu0 %v2270_v62  ;;  %v2358_v62 = vpack.c.bf16 %v1028_v58, %v1025_v55  ;;  %v2376_v55 = vpack.c.bf16 %v1004_v54, %v1001_v53  ;;  %v2330_v53 = vpack.c.bf16 %v1081_v49, %v1078_v48  ;;  %v1080_v54 = vld [vmem:[#allocation7 + $0x918] sm:$0xff]  ;;  %v1425_v48 = vld [vmem:[#allocation5 + $0x1b0] sm:$0xff] }
 0x3d1   :  { %2359 = vmatprep.subr.bf16.mxu1 %v2358_v62  ;;  %v655_v62 = vld [vmem:[#allocation7 + $0x9d8] ss:$8 sm:$0x7] }
 0x3d2   :  { %2273 = vmatpush1.bf16.msra.mxu0 %v2272_v9  ;;  %v1031_v9 = vld [vmem:[#allocation7 + $0x790] sm:$0xff]  ;;  %2361 = vmatpush3.bf16.msra.mxu1 %v2360_v13  ;;  %v668_v63 = vrot.slane %v655_v62, %v2693_v14  ;;  %v660_v2 = vrot.slane %v655_v62, %v2672_v4  ;;  %v664_v7 = vrot.slane %v655_v62, %v2677_v6 }
 0x3d3   :  { %2275 = vmatprep.subr.bf16.mxu0 %v2274_v11  ;;  %v1034_v11 = vld [vmem:[#allocation7 + $0x7a8] sm:$0xff] }
 0x3d6   :  { %2277 = vmatpush1.bf16.msra.mxu0 %v2276_v15  ;;  %v1029_v15 = vld [vmem:[#allocation7 + $0x780] sm:$0xff] }
 0x3d7   :  { %2279 = vmatprep.subr.bf16.mxu0 %v2278_v18  ;;  %v2362_v18 = vpack.c.bf16 %v1034_v11, %v1031_v9 }
 0x3d9   :  { %2363 = vmatprep.subr.bf16.mxu1 %v2362_v18  ;;  %v1056_v18 = vld [vmem:[#allocation7 + $0x858] sm:$0xff] }
 0x3da   :  { %2281 = vmatpush1.bf16.msra.mxu0 %v2280_v21  ;;  %v1036_v21 = vld [vmem:[#allocation7 + $0x7b8] sm:$0xff]  ;;  %2365 = vmatpush3.bf16.msra.mxu1 %v2364_v25  ;;  %v2379_v25 = vpack.c.bf16 %v1058_v20, %v1055_v19  ;;  %v1094_v19 = vld [vmem:[#allocation7 + $0x988] sm:$0xff] }
 0x3db   :  { %2283 = vmatprep.subr.bf16.mxu0 %v2282_v3  ;;  %v2300_v3 = vpack.c.bf16 %v1032_v16, %v1029_v15  ;;  %v2302_v28 = vpack.c.bf16 %v1039_v22, %v1036_v21  ;;  %v1060_v22 = vld [vmem:[#allocation7 + $0x878] sm:$0xff] }
 0x3dc   :  { %v1096_v20 = vld [vmem:[#allocation7 + $0x998] sm:$0xff] }
 0x3de   :  { %2285 = vmatpush1.bf16.msra.mxu0 %v2284_v29  ;;  %v2366_v29 = vpack.c.bf16 %v1040_v24, %v1037_v23  ;;  %v1063_v23 = vld [vmem:[#allocation7 + $0x890] sm:$0xff] }
 0x3df   :  { %2287 = vmatprep.subr.bf16.mxu0 %v2286_v36  ;;  %v2368_v36 = vpack.c.bf16 %v992_v31, %v989_v30  ;;  %v1061_v30 = vld [vmem:[#allocation7 + $0x880] sm:$0xff]  ;;  %v1064_v31 = vld [vmem:[#allocation7 + $0x898] sm:$0xff] }
 0x3e0   :  { %2367 = vmatprep.subr.bf16.mxu1 %v2366_v29  ;;  %v1062_v29 = vld [vmem:[#allocation7 + $0x888] sm:$0xff]  ;;  %v2382_v34 = vpack.c.bf16 %v1064_v31, %v1061_v30  ;;  %v1436_v31 = vld [vmem:[#allocation5 + $0x208] sm:$0xff] }
 0x3e1   :  { %2369 = vmatpush3.bf16.msra.mxu1 %v2368_v36  ;;  %v2320_v5 = vpack.c.bf16 %v1062_v29, %v1059_v26  ;;  %v2322_v36 = vpack.c.bf16 %v1069_v33, %v1066_v32  ;;  %v1097_v26 = vld [vmem:[#allocation7 + $0x9a0] sm:$0xff]  ;;  %v1437_v32 = vld [vmem:[#allocation5 + $0x210] sm:$0xff] }
 0x3e2   :  { %2289 = vmatpush1.bf16.msra.mxu0 %v2288_v41  ;;  %v995_v41 = vld [vmem:[#allocation7 + $0x670] sm:$0xff]  ;;  %2371 = vmatprep.subr.bf16.mxu1 %v2370_v39  ;;  %v1070_v39 = vld [vmem:[#allocation7 + $0x8c8] sm:$0xff]  ;;  %v1420_v33 = vld [vmem:[#allocation5 + $0x188] sm:$0xff] }
 0x3e3   :  { %2291 = vmatprep.subr.bf16.mxu0 %v2290_v45  ;;  %v2372_v10 = vpack.c.bf16 %v998_v42, %v995_v41  ;;  %v1051_v45 = vld [vmem:[#allocation7 + $0x830] sm:$0xff] }
 0x3e4   :  { %v2310_v47 = vpack.c.bf16 %v1051_v45, %v1048_v44  ;;  %v1075_v41 = vld [vmem:[#allocation7 + $0x8f0] sm:$0xff]  ;;  %v1074_v45 = vld [vmem:[#allocation7 + $0x8e8] sm:$0xff] }
 0x3e5   :  { %2373 = vmatpush3.bf16.msra.mxu1 %v2372_v10  ;;  %v1071_v10 = vld [vmem:[#allocation7 + $0x8d0] sm:$0xff]  ;;  %v2326_v44 = vpack.c.bf16 %v1075_v41, %v1072_v40  ;;  %v1439_v40 = vld [vmem:[#allocation5 + $0x220] sm:$0xff] }
 0x3e6   :  { %2293 = vmatpush1.bf16.msra.mxu0 %v2292_v56  ;;  %2375 = vmatprep.subr.bf16.mxu1 %v2374_v51  ;;  %v1054_v56 = vld [vmem:[#allocation7 + $0x848] sm:$0xff]  ;;  %v2328_v50 = vpack.c.bf16 %v1074_v45, %v1071_v10  ;;  %v1422_v41 = vld [vmem:[#allocation5 + $0x198] sm:$0xff]  ;;  %v1407_v10 = vld [vmem:[#allocation5 + $0x120] sm:$0xff] }
 0x3e7   :  { %2295 = vmatprep.subr.bf16.mxu0 %v2294_v61  ;;  %v2314_v58 = vpack.c.bf16 %v1057_v57, %v1054_v56  ;;  %v1082_v56 = vld [vmem:[#allocation7 + $0x928] sm:$0xff]  ;;  %v1084_v57 = vld [vmem:[#allocation7 + $0x938] sm:$0xff] }
 0x3e8   :  { %v1441_v45 = vld [vmem:[#allocation5 + $0x230] sm:$0xff] }
 0x3e9   :  { %2377 = vmatpush3.bf16.msra.mxu1 %v2376_v55  ;;  %v1079_v55 = vld [vmem:[#allocation7 + $0x910] sm:$0xff] }
 0x3ea   :  { %2297 = vmatpush1.bf16.msra.mxu0 %v2296_v12  ;;  %2378 = vmatprep.subr.bf16.mxu1 %v2580_v1  ;;  %v1053_v12 = vld [vmem:[#allocation7 + $0x840] sm:$0xff] }
 0x3eb   :  { %2299 = vmatprep.subr.bf16.mxu0 %v2298_v17 }
 0x3ee   :  { %2301 = vmatpush1.bf16.msra.mxu0 %v2300_v3  ;;  %v2316_v3 = vpack.c.bf16 %v1056_v18, %v1053_v12  ;;  %v1091_v18 = vld [vmem:[#allocation7 + $0x970] sm:$0xff] }
 0x3ef   :  { %2303 = vmatprep.subr.bf16.mxu0 %v2302_v28  ;;  %v2318_v28 = vpack.c.bf16 %v1063_v23, %v1060_v22  ;;  %v2397_v23 = vpack.c.bf16 %v1094_v19, %v1091_v18  ;;  %v1446_v18 = vld [vmem:[#allocation5 + $0x258] sm:$0xff]  ;;  %v1447_v19 = vld [vmem:[#allocation5 + $0x260] sm:$0xff] }
 0x3f2   :  { %2305 = vmatpush1.bf16.msra.mxu0 %v2304_v35  ;;  %v1065_v35 = vld [vmem:[#allocation7 + $0x8a0] sm:$0xff] }
 0x3f3   :  { %2307 = vmatprep.subr.bf16.mxu0 %v2306_v38  ;;  %v1067_v38 = vld [vmem:[#allocation7 + $0x8b0] sm:$0xff]  ;;  %v2324_v42 = vpack.c.bf16 %v1068_v37, %v1065_v35  ;;  %v1404_v35 = vld [vmem:[#allocation5 + $0x108] sm:$0xff] }
 0x3f6   :  { %2309 = vmatpush1.bf16.msra.mxu0 %v2308_v43  ;;  %v2385_v43 = vpack.c.bf16 %v1070_v39, %v1067_v38  ;;  %v1438_v39 = vld [vmem:[#allocation5 + $0x218] sm:$0xff] }
 0x3f7   :  { %2311 = vmatprep.subr.bf16.mxu0 %v2310_v47  ;;  %v1076_v47 = vld [vmem:[#allocation7 + $0x8f8] sm:$0xff] }
 0x3f8   :  { %v2388_v51 = vpack.c.bf16 %v1076_v47, %v1073_v46  ;;  %v1424_v46 = vld [vmem:[#allocation5 + $0x1a8] sm:$0xff] }
 0x3f9   :  { %v2410_v49 = vpack.c.bf16 %v1425_v48, %v1424_v46 }
 0x3fa   :  { %2313 = vmatpush1.bf16.msra.mxu0 %v2312_v52  ;;  %v1077_v52 = vld [vmem:[#allocation7 + $0x900] sm:$0xff] }
 0x3fb   :  { %2315 = vmatprep.subr.bf16.mxu0 %v2314_v58  ;;  %v1087_v58 = vld [vmem:[#allocation7 + $0x950] sm:$0xff] }
 0x3fc   :  { %v2334_v62 = vpack.c.bf16 %v1087_v58, %v1084_v57 }
 0x470   :  { %v1699_v59 = vpop.f32.mrb[6].mxu0 }
 0x471   :  { %v1700_v60 = vpop.f32.mrb[7].mxu0 }
 0x472   :  { %v1701_v61 = vadd.f32 %v1700_v60, %v1699_v59  ;;  %v2332_v59 = vpack.c.bf16 %v1080_v54, %v1077_v52  ;;  %v2391_v60 = vpack.c.bf16 %v1082_v56, %v1079_v55  ;;  %v1427_v54 = vld [vmem:[#allocation5 + $0x1c0] sm:$0xff]  ;;  %v1442_v55 = vld [vmem:[#allocation5 + $0x238] sm:$0xff] }
 0x473   :  { %v1443_v56 = vld [vmem:[#allocation5 + $0x240] sm:$0xff] }
 0x474   :  { %v881_v8 = vadd.f32 %v1701_v61, %v668_v63  ;;  %v1083_v61 = vld [vmem:[#allocation7 + $0x930] sm:$0xff]  ;;  %v1086_v63 = vld [vmem:[#allocation7 + $0x948] sm:$0xff] }
 0x490   :  { %v809_v9 = vpop.f32.mrb[4].mxu1  ;;  %v950_v11 = vpop.f32.mrb[8].mxu0 }
 0x491   :  { %v2458_v13 = vadd.f32 %v809_v9, %v660_v2  ;;  %v2705_v15 = vadd.f32 %v950_v11, %v881_v8  ;;  %v811_v16 = vpop.f32.mrb[5].mxu1  ;;  %v1951_v17 = vpop.f32.mrb[9].mxu0  ;;  %v1085_v2 = vld [vmem:[#allocation7 + $0x940] sm:$0xff]  ;;  %v1090_v8 = vld [vmem:[#allocation7 + $0x968] sm:$0xff]  ;;  %v2336_v11 = vpack.c.bf16 %v1086_v63, %v1083_v61  ;;  %v2444_v61 = vpack.c.bf16 %v1443_v56, %v1442_v55 }
 0x492   :  { %v2459_v21 = vadd.f32 %v811_v16, %v664_v7  ;;  %v1088_v7 = vld [vmem:[#allocation7 + $0x958] sm:$0xff]  ;;  %v1093_v9 = vld [vmem:[#allocation7 + $0x980] sm:$0xff]  ;;  %v1429_v63 = vld [vmem:[#allocation5 + $0x1d0] sm:$0xff] }
 0x493   :  { %v954_v27 = vmax.f32 %v2458_v13, 0.0  ;;  %v2394_v12 = vpack.c.bf16 %v1088_v7, %v1085_v2  ;;  %v1089_v13 = vld [vmem:[#allocation7 + $0x960] sm:$0xff]  ;;  %v2338_v16 = vpack.c.bf16 %v1093_v9, %v1090_v8  ;;  %v1092_v17 = vld [vmem:[#allocation7 + $0x978] sm:$0xff]  ;;  %v956_v30 = vmax.f32 %v2705_v15, 0.0  ;;  %v1445_v7 = vld [vmem:[#allocation5 + $0x250] sm:$0xff] }
 0x494   :  { %v955_v24 = vmax.f32 %v2459_v21, 0.0  ;;  %v1099_v21 = vld [vmem:[#allocation7 + $0x9b0] sm:$0xff]  ;;  %v2340_v22 = vpack.c.bf16 %v1092_v17, %v1089_v13  ;;  %v2438_v15 = vpack.c.bf16 %v1439_v40, %v1438_v39  ;;  %v1444_v2 = vld [vmem:[#allocation5 + $0x248] sm:$0xff]  ;;  %v1431_v17 = vld [vmem:[#allocation5 + $0x1e0] sm:$0xff] }
 0x495   :  { %v2447_v13 = vpack.c.bf16 %v1445_v7, %v1444_v2  ;;  %v1418_v39 = vld [vmem:[#allocation5 + $0x178] sm:$0xff]  ;;  %v1419_v40 = vld [vmem:[#allocation5 + $0x180] sm:$0xff] }
 0x496   :  { %1183 = vmatprep.mubr.f32.mxu0 %v955_v24  ;;  %1325 = vmatprep.mubr.f32.mxu1 %v955_v24  ;;  %v1095_v24 = vld [vmem:[#allocation7 + $0x990] sm:$0xff] }
 0x497   :  { %1184 = vmatmul.mubr.f32.vlgmr.msra.gmra.mrb[10].mxu0 %v954_v27  ;;  %1326 = vmatmul.mubr.f32.vlgmr.msra.gmra.mrb[6].mxu1 %v954_v27  ;;  %v1100_v27 = vld [vmem:[#allocation7 + $0x9b8] sm:$0xff] }
 0x498   :  { %2317 = vmatpush1.bf16.msra.mxu0 %v2316_v3  ;;  %2380 = vmatpush3.bf16.msra.mxu1 %v2379_v25  ;;  %v2342_v3 = vpack.c.bf16 %v1099_v21, %v1096_v20  ;;  %v1098_v25 = vld [vmem:[#allocation7 + $0x9a8] sm:$0xff]  ;;  %v2400_v29 = vpack.c.bf16 %v1100_v27, %v1097_v26  ;;  %v1448_v26 = vld [vmem:[#allocation5 + $0x268] sm:$0xff] }
 0x499   :  { %2319 = vmatprep.subr.bf16.mxu0 %v2318_v28  ;;  %2381 = vmatprep.subr.bf16.mxu1 %v2580_v1  ;;  %v2344_v28 = vpack.c.bf16 %v1098_v25, %v1095_v24  ;;  %v2450_v24 = vpack.c.bf16 %v1447_v19, %v1446_v18  ;;  %v1433_v25 = vld [vmem:[#allocation5 + $0x1f0] sm:$0xff] }
 0x49a   :  { %1254 = vmatprep.mubr.f32.mxu0 %v2578_v0  ;;  %1984 = vmatprep.mubr.msk.f32.mxu1 %vm2579_vm0, %v2578_v0  ;;  %v1449_v27 = vld [vmem:[#allocation5 + $0x270] sm:$0xff] }
 0x49c   :  { %2321 = vmatpush1.bf16.msra.mxu0 %v2320_v5  ;;  %2383 = vmatpush3.bf16.msra.mxu1 %v2382_v34  ;;  %v2435_v5 = vpack.c.bf16 %v1437_v32, %v1436_v31  ;;  %v1421_v34 = vld [vmem:[#allocation5 + $0x190] sm:$0xff]  ;;  %v1416_v31 = vld [vmem:[#allocation5 + $0x168] sm:$0xff] }
 0x49d   :  { %2323 = vmatprep.subr.bf16.mxu0 %v2322_v36  ;;  %2384 = vmatprep.subr.bf16.mxu1 %v2580_v1  ;;  %v1405_v36 = vld [vmem:[#allocation5 + $0x110] sm:$0xff]  ;;  %v2402_v37 = vpack.c.bf16 %v1421_v34, %v1420_v33  ;;  %v1451_v34 = vld [vmem:[#allocation5 + $0x280] sm:$0xff] }
 0x49e   :  { %v2404_v38 = vpack.c.bf16 %v1405_v36, %v1404_v35  ;;  %v1417_v32 = vld [vmem:[#allocation5 + $0x170] sm:$0xff]  ;;  %v1434_v36 = vld [vmem:[#allocation5 + $0x1f8] sm:$0xff] }
 0x49f   :  { %v2428_v33 = vpack.c.bf16 %v1417_v32, %v1416_v31 }
 0x4a0   :  { %2325 = vmatpush1.bf16.msra.mxu0 %v2324_v42  ;;  %2386 = vmatpush3.bf16.msra.mxu1 %v2385_v43  ;;  %v1423_v42 = vld [vmem:[#allocation5 + $0x1a0] sm:$0xff]  ;;  %v1406_v43 = vld [vmem:[#allocation5 + $0x118] sm:$0xff] }
 0x4a1   :  { %2327 = vmatprep.subr.bf16.mxu0 %v2326_v44  ;;  %2387 = vmatprep.subr.bf16.mxu1 %v2580_v1  ;;  %v1440_v44 = vld [vmem:[#allocation5 + $0x228] sm:$0xff]  ;;  %v2408_v47 = vpack.c.bf16 %v1407_v10, %v1406_v43 }
 0x4a2   :  { %v2441_v52 = vpack.c.bf16 %v1441_v45, %v1440_v44  ;;  %v1102_v10 = vld [vmem:[#allocation7 + $0x9f0] ss:$8 sm:$0x7] }
 0x4a3   :  { %v1111_v44 = vrot.slane %v1102_v10, %v2677_v6 }
 0x4a4   :  { %2329 = vmatpush1.bf16.msra.mxu0 %v2328_v50  ;;  %2389 = vmatpush3.bf16.msra.mxu1 %v2388_v51  ;;  %v1408_v50 = vld [vmem:[#allocation5 + $0x128] sm:$0xff]  ;;  %v1409_v51 = vld [vmem:[#allocation5 + $0x130] sm:$0xff] }
 0x4a5   :  { %2331 = vmatprep.subr.bf16.mxu0 %v2330_v53  ;;  %2390 = vmatprep.subr.bf16.mxu1 %v2580_v1  ;;  %v1426_v53 = vld [vmem:[#allocation5 + $0x1b8] sm:$0xff]  ;;  %v2412_v57 = vpack.c.bf16 %v1409_v51, %v1408_v50 }
 0x4a6   :  { %v2414_v58 = vpack.c.bf16 %v1427_v54, %v1426_v53 }
 0x4a8   :  { %2333 = vmatpush1.bf16.msra.mxu0 %v2332_v59  ;;  %2392 = vmatpush3.bf16.msra.mxu1 %v2391_v60  ;;  %v1410_v59 = vld [vmem:[#allocation5 + $0x138] sm:$0xff]  ;;  %v1411_v60 = vld [vmem:[#allocation5 + $0x140] sm:$0xff] }
 0x4a9   :  { %2335 = vmatprep.subr.bf16.mxu0 %v2334_v62  ;;  %2393 = vmatprep.subr.bf16.mxu1 %v2580_v1  ;;  %v1428_v62 = vld [vmem:[#allocation5 + $0x1c8] sm:$0xff]  ;;  %v2416_v8 = vpack.c.bf16 %v1411_v60, %v1410_v59 }
 0x4aa   :  { %v2418_v9 = vpack.c.bf16 %v1429_v63, %v1428_v62 }
 0x4ac   :  { %2337 = vmatpush1.bf16.msra.mxu0 %v2336_v11  ;;  %2395 = vmatpush3.bf16.msra.mxu1 %v2394_v12  ;;  %v1412_v11 = vld [vmem:[#allocation5 + $0x148] sm:$0xff]  ;;  %v1413_v12 = vld [vmem:[#allocation5 + $0x150] sm:$0xff] }
 0x4ad   :  { %2339 = vmatprep.subr.bf16.mxu0 %v2338_v16  ;;  %2396 = vmatprep.subr.bf16.mxu1 %v2580_v1  ;;  %v1430_v16 = vld [vmem:[#allocation5 + $0x1d8] sm:$0xff]  ;;  %v2420_v20 = vpack.c.bf16 %v1413_v12, %v1412_v11 }
 0x4ae   :  { %v2422_v21 = vpack.c.bf16 %v1431_v17, %v1430_v16 }
 0x4b0   :  { %2341 = vmatpush1.bf16.msra.mxu0 %v2340_v22  ;;  %2398 = vmatpush3.bf16.msra.mxu1 %v2397_v23  ;;  %v1414_v22 = vld [vmem:[#allocation5 + $0x158] sm:$0xff]  ;;  %v1415_v23 = vld [vmem:[#allocation5 + $0x160] sm:$0xff] }
 0x4b1   :  { %2343 = vmatprep.subr.bf16.mxu0 %v2342_v3  ;;  %2399 = vmatprep.subr.bf16.mxu1 %v2580_v1  ;;  %v1432_v3 = vld [vmem:[#allocation5 + $0x1e8] sm:$0xff] }
 0x4b4   :  { %2345 = vmatpush1.bf16.msra.mxu0 %v2344_v28  ;;  %2401 = vmatpush3.bf16.msra.mxu1 %v2400_v29  ;;  %v2424_v28 = vpack.c.bf16 %v1415_v23, %v1414_v22  ;;  %v2426_v29 = vpack.c.bf16 %v1433_v25, %v1432_v3 }
 0x4b5   :  { %2434 = vmatprep.subr.bf16.mxu0 %v2580_v1  ;;  %2403 = vmatprep.subr.bf16.mxu1 %v2402_v37  ;;  %v1435_v37 = vld [vmem:[#allocation5 + $0x200] sm:$0xff] }
 0x4b7   :  { %1255 = vmatmul.mubr.f32.vlgmr.msra.gmra.mrb[10].mxu0 %v956_v30  ;;  %1985 = vmatmul.mubr.f32.vlgmr.msra.gmra.mrb[8].mxu1 %v956_v30  ;;  %v2453_v30 = vpack.c.bf16 %v1449_v27, %v1448_v26 }
 0x4b8   :  { %2019 = vmatprep.mubr.msk.f32.mxu0 %vm2579_vm0, %v2578_v0  ;;  %2436 = vmatpush3.bf16.msra.mxu0 %v2435_v5  ;;  %v2406_v0 = vpack.c.bf16 %v1423_v42, %v1422_v41  ;;  %v1450_v5 = vld [vmem:[#allocation5 + $0x278] sm:$0xff]  ;;  %v2432_v41 = vpack.c.bf16 %v1419_v40, %v1418_v39 }
 0x4b9   :  { %2437 = vmatprep.subr.bf16.mxu0 %v2580_v1  ;;  %2405 = vmatpush3.bf16.msra.mxu1 %v2404_v38  ;;  %v2456_v35 = vpack.c.bf16 %v1451_v34, %v1450_v5  ;;  %v2430_v38 = vpack.c.bf16 %v1435_v37, %v1434_v36 }
 0x4ba   :  { %2407 = vmatprep.subr.bf16.mxu1 %v2406_v0  ;;  %v1115_v0 = vrot.slane %v1102_v10, %v2693_v14 }
 0x4bc   :  { %2439 = vmatpush3.bf16.msra.mxu0 %v2438_v15 }
 0x4bd   :  { %2440 = vmatprep.subr.bf16.mxu0 %v2580_v1  ;;  %2409 = vmatpush3.bf16.msra.mxu1 %v2408_v47 }
 0x4be   :  { %2411 = vmatprep.subr.bf16.mxu1 %v2410_v49 }
 0x4c0   :  { %2442 = vmatpush3.bf16.msra.mxu0 %v2441_v52 }
 0x4c1   :  { %2443 = vmatprep.subr.bf16.mxu0 %v2580_v1  ;;  %2413 = vmatpush3.bf16.msra.mxu1 %v2412_v57 }
 0x4c2   :  { %2415 = vmatprep.subr.bf16.mxu1 %v2414_v58 }
 0x4c4   :  { %2445 = vmatpush3.bf16.msra.mxu0 %v2444_v61 }
 0x4c5   :  { %2446 = vmatprep.subr.bf16.mxu0 %v2580_v1  ;;  %2417 = vmatpush3.bf16.msra.mxu1 %v2416_v8 }
 0x4c6   :  { %2419 = vmatprep.subr.bf16.mxu1 %v2418_v9 }
 0x4c8   :  { %2448 = vmatpush3.bf16.msra.mxu0 %v2447_v13 }
 0x4c9   :  { %2449 = vmatprep.subr.bf16.mxu0 %v2580_v1  ;;  %2421 = vmatpush3.bf16.msra.mxu1 %v2420_v20 }
 0x4ca   :  { %2423 = vmatprep.subr.bf16.mxu1 %v2422_v21 }
 0x4cc   :  { %2451 = vmatpush3.bf16.msra.mxu0 %v2450_v24 }
 0x4cd   :  { %2452 = vmatprep.subr.bf16.mxu0 %v2580_v1  ;;  %2425 = vmatpush3.bf16.msra.mxu1 %v2424_v28 }
 0x4ce   :  { %2427 = vmatprep.subr.bf16.mxu1 %v2426_v29 }
 0x4d0   :  { %2454 = vmatpush3.bf16.msra.mxu0 %v2453_v30 }
 0x4d1   :  { %2455 = vmatprep.subr.bf16.mxu0 %v2580_v1  ;;  %2429 = vmatpush3.bf16.msra.mxu1 %v2428_v33  ;;  %v1107_v1 = vrot.slane %v1102_v10, %v2672_v4  ;;  %v1621_v4 = vld [vmem:[#allocation5 + $0x2a0] ss:$0 sm:$0xff] }
 0x4d2   :  { %2431 = vmatprep.subr.bf16.mxu1 %v2430_v38 }
 0x4d4   :  { %2457 = vmatpush3.bf16.msra.mxu0 %v2456_v35 }
 0x4d5   :  { %2433 = vmatpush3.bf16.msra.mxu1 %v2432_v41 }
 0x56a   :  { %v1751_v15 = vpop.f32.mrb[6].mxu1 }
 0x56b   :  { %v1752_v42 = vpop.f32.mrb[7].mxu1 }
 0x56c   :  { %v1753_v43 = vadd.f32 %v1752_v42, %v1751_v15 }
 0x56e   :  { %v1328_v45 = vadd.f32 %v1753_v43, %v1115_v0 }
 0x58a   :  { %v1256_v46 = vpop.f32.mrb[10].mxu0  ;;  %v1397_v47 = vpop.f32.mrb[8].mxu1 }
 0x58b   :  { %v2460_v48 = vadd.f32 %v1256_v46, %v1107_v1  ;;  %v1398_v49 = vadd.f32 %v1397_v47, %v1328_v45  ;;  %v1258_v50 = vpop.f32.mrb[11].mxu0  ;;  %v1986_v51 = vpop.f32.mrb[9].mxu1 }
 0x58c   :  { %v2461_v52 = vadd.f32 %v1258_v50, %v1111_v44 }
 0x58d   :  { %v1403_v53 = vmax.f32 %v1398_v49, 0.0  ;;  %v1401_v55 = vmax.f32 %v2460_v48, 0.0 }
 0x58e   :  { %v1402_v54 = vmax.f32 %v2461_v52, 0.0 }
 0x58f   :  { %2020 = vmatmul.mubr.f32.vlgmr.msra.gmra.mrb[12].mxu0 %v1403_v53 }
 0x590   :  { %1521 = vmatprep.mubr.f32.mxu1 %v1402_v54 }
 0x591   :  { %1522 = vmatmul.mubr.f32.vlgmr.msra.gmra.mrb[10].mxu1 %v1401_v55 }
 0x662   :  { %v1593_v56 = vpop.f32.mrb[12].mxu0 }
 0x663   :  { %v2021_v14 = vpop.f32.mrb[13].mxu0 }
 0x664   :  { %v1803_v57 = vpop.f32.mrb[10].mxu1 }
 0x665   :  { %v1804_v58 = vpop.f32.mrb[11].mxu1 }
 0x666   :  { %v1805_v6 = vadd.f32 %v1804_v58, %v1803_v57 }
 0x668   :  { %v1524_v59 = vadd.f32 %v1805_v6, %v1621_v4 }
 0x66a   :  { %v1594_v60 = vadd.f32 %v1593_v56, %v1524_v59 }
 0x66c   :  { %1598 = vst.msk [vmem:[#allocation8] sm:$0xff] %vm1597_vm3, %v1594_v60 }
 0x66d   :  { %2554 = shalt.err (!%p2551_p0)
}
 0x66e   :  { %s2555_s27 = scalar_lea.hbm %s2746_s3, 128 }
 0x66f   :  { %p2556_p1 = scmp.ne.s32.totalorder %s2746_s3, %s2555_s27  ;;  %p2559_p2 = scmp.lt.u32.totalorder %s2555_s27, %s2746_s3 }
 0x671   :  { %p2561_p3 = pnand %p2559_p2, %p2556_p1 }
 0x673   :  { %2564 = shalt.err (!%p2561_p3)
}
 0x674   :  { %1608 = dma.vmem_to_hbm [thread:$0]  %s1606_s23, 128, %s2746_s3, [#allocation4]  }
 0x675   :  { %2569 = dma.done.wait [#allocation4], 128  }
 0x676   :  { %2570 = vsyncadd [#allocation4], 4294967168 }
 0x677   :  { %1612 = vsyncpa [#allocation3], 1 }
 0x678   :  { %1613 = vsyncpa [#allocation6], 1 }
 0x679   :  { %1614 = vsyncpa [#allocation4], 1 }

</bundles_post_ra>
